<compile_context>
chip_gen: v6e
topology: v6e:2x2x1
jax: 0.10.0
libtpu: 0.0.40
codegen_flags: <defaults>
</compile_context>

<pallas_src>
import functools

import jax
import jax.numpy as jnp
from jax.experimental import pallas as pl
from jax.experimental.pallas import tpu as pltpu


def _round_up(n, m):
    return ((n + m - 1) // m) * m


# ----------------------------------------------------------------------------
# In-kernel helpers (operate on (H, W, Bt, C) values; H/W are leading dims so
# all slicing/indexing below is whole-(Bt, C)-slab addressing, no lane shuffles)
# ----------------------------------------------------------------------------
def _pool2x2(x):
    """2x2 / stride-2 max pool over the two leading (H, W) dims.

    Two whole-array maxima on leading-dim reshapes (layout no-ops) -- fewer
    ops than the 16-slab loop or 3 strided-slice maxima.
    """
    h, w, bt, c = x.shape
    xr = x.reshape(h // 2, 2, w, bt, c)
    rows = jnp.maximum(xr[:, 0], xr[:, 1])            # (h/2, w,  Bt, C)
    rr = rows.reshape(h // 2, w // 2, 2, bt, c)
    return jnp.maximum(rr[:, :, 0], rr[:, :, 1])      # (h/2, w/2, Bt, C)


def _pad_hw1(x):
    """Zero-pad the two leading (H, W) dims of (H, W, Bt, C) by 1 (same dtype)."""
    h, w, bt, c = x.shape
    zr = jnp.zeros((1, w, bt, c), x.dtype)
    x = jnp.concatenate([zr, x, zr], axis=0)          # (H+2, W,   Bt, C)
    zc = jnp.zeros((h + 2, 1, bt, c), x.dtype)
    return jnp.concatenate([zc, x, zc], axis=1)       # (H+2, W+2, Bt, C)


# ----------------------------------------------------------------------------
# The fused forward kernel (one batch tile per grid step)
# ----------------------------------------------------------------------------
def _chess_cnn_kernel(xf_ref, w1_ref, b1_ref, w2_ref, b2_ref,
                      wf1_ref, bf1_ref, wf2_ref, bf2_ref, o_ref, *, bt):
    # ---- conv1 (17 -> 64, 3x3 "same") + ReLU -------------------------------
    # xf arrives dx-folded & zero-padded from the host (bf16):
    #   xf[r, j, :, dx*17 + c] == xpad[r, j+dx, :, c]       shape (10, 8, Bt, 51)
    # so the 3x3 conv is 3 accumulated K=51 MXU dots (one per dy).
    xf = xf_ref[...]
    m1 = 8 * 8 * bt
    acc1 = jnp.dot(xf[0:8].reshape(m1, 51), w1_ref[0],
                   preferred_element_type=jnp.float32)
    acc1 = acc1 + jnp.dot(xf[1:9].reshape(m1, 51), w1_ref[1],
                          preferred_element_type=jnp.float32)
    acc1 = acc1 + jnp.dot(xf[2:10].reshape(m1, 51), w1_ref[2],
                          preferred_element_type=jnp.float32)
    a1 = jnp.maximum(acc1 + b1_ref[...], 0.0).reshape(8, 8, bt, 64)  # f32

    # ---- 2x2 max pool, then a single cast to bf16 --------------------------
    p1 = _pool2x2(a1).astype(jnp.bfloat16)            # (4, 4, Bt, 64)

    # ---- conv2 (64 -> 128, 3x3 "same") + ReLU -------------------------------
    # dx-fold in VMEM: concat three shifted 64-lane chunks -> K=192, 3 dy-dots.
    p1p = _pad_hw1(p1)                                # (6, 6, Bt, 64) bf16
    xw = jnp.concatenate([p1p[:, d:d + 4] for d in range(3)], axis=-1)  # (6,4,Bt,192)
    m2 = 4 * 4 * bt
    acc2 = jnp.dot(xw[0:4].reshape(m2, 192), w2_ref[0],
                   preferred_element_type=jnp.float32)
    acc2 = acc2 + jnp.dot(xw[1:5].reshape(m2, 192), w2_ref[1],
                          preferred_element_type=jnp.float32)
    acc2 = acc2 + jnp.dot(xw[2:6].reshape(m2, 192), w2_ref[2],
                          preferred_element_type=jnp.float32)
    a2 = jnp.maximum(acc2 + b2_ref[...], 0.0).reshape(4, 4, bt, 128)  # f32

    # ---- 2x2 max pool + fc1 (512 -> 64) + ReLU, as ONE K=512 dot ------------
    p2 = _pool2x2(a2)                                 # (2, 2, Bt, 128) f32
    win = jnp.concatenate([p2[0, 0], p2[0, 1], p2[1, 0], p2[1, 1]],
                          axis=-1)                    # (Bt, 512), 128-aligned
    a3 = jnp.dot(win.astype(jnp.bfloat16), wf1_ref[...],
                 preferred_element_type=jnp.float32)
    a3 = jnp.maximum(a3 + bf1_ref[...], 0.0)          # (Bt, 64) f32

    # ---- fc2 (64 -> 1) as VPU multiply + lane reduction, then tanh ----------
    y = jnp.sum(a3 * wf2_ref[...], axis=1, keepdims=True) + bf2_ref[...]
    o_ref[...] = jnp.tanh(y).astype(o_ref.dtype)      # (Bt, 1)


# ----------------------------------------------------------------------------
# Host-side wrapper: layout plumbing only (transpose, batch pad, conv1 dx-fold,
# weight reshapes -- all free/fused XLA ops), then one pallas_call.
# ----------------------------------------------------------------------------
def chess_cnn_forward(x_nchw, params, *, block_b=128):
    assert x_nchw.shape[1:] == (17, 8, 8), x_nchw.shape
    B = x_nchw.shape[0]

    # Batch tile: always a multiple of 8 (sublane granularity), and shrunk so
    # the "parallel" batch grid axis has >= 2 steps when the batch allows
    # (engages both v7x TensorCores).  bt=128 keeps the per-tile footprint a
    # few MB, safely under a 32 MiB scoped VMEM limit on every generation.
    b8 = _round_up(B, 8)
    bt = min(_round_up(block_b, 8), b8)
    if b8 > 8 and b8 <= bt:
        bt = _round_up((b8 + 1) // 2, 8)
    Bp = _round_up(B, bt)

    # NCHW -> (H, W, B, C) bf16.  (Input is quantized to bf16 for the MXU --
    # an input-side precision tradeoff covered by the test tolerance.)
    x = jnp.transpose(x_nchw, (2, 3, 0, 1)).astype(jnp.bfloat16)
    if Bp != B:
        x = jnp.pad(x, ((0, 0), (0, 0), (0, Bp - B), (0, 0)))
    # Host-side zero-pad + dx-fold for conv1: (10, 8, Bp, 51) bf16.
    xp = jnp.pad(x, ((1, 1), (1, 1), (0, 0), (0, 0)))
    xf = jnp.concatenate([xp[:, d:d + 8] for d in range(3)], axis=-1)

    # K-folded weight views (free host reshapes of the stored layouts).
    w1f = params["w1"].reshape(3, 3 * 17, 64)          # [dy, dx*17+cin, cout]
    w2f = params["w2"].reshape(3, 3 * 64, 128)         # [dy, dx*64+cin, cout]
    wf1f = params["wf1"].reshape(2 * 2 * 128, 64)      # [(h*2+w)*128+cin, cout]

    kern = functools.partial(_chess_cnn_kernel, bt=bt)
    out = pl.pallas_call(
        kern,
        out_shape=jax.ShapeDtypeStruct((Bp, 1), jnp.float32),
        grid=(Bp // bt,),
        in_specs=[
            pl.BlockSpec((10, 8, bt, 51), lambda i: (0, 0, i, 0)),   # folded x
            pl.BlockSpec((3, 51, 64), lambda i: (0, 0, 0)),          # w1 folded
            pl.BlockSpec((1, 64), lambda i: (0, 0)),                 # b1
            pl.BlockSpec((3, 192, 128), lambda i: (0, 0, 0)),        # w2 folded
            pl.BlockSpec((1, 128), lambda i: (0, 0)),                # b2
            pl.BlockSpec((512, 64), lambda i: (0, 0)),               # wf1 folded
            pl.BlockSpec((1, 64), lambda i: (0, 0)),                 # bf1
            pl.BlockSpec((1, 64), lambda i: (0, 0)),                 # wf2
            pl.BlockSpec((1, 1), lambda i: (0, 0)),                  # bf2
        ],
        out_specs=pl.BlockSpec((bt, 1), lambda i: (i, 0)),
        compiler_params=pltpu.CompilerParams(
            dimension_semantics=("parallel",),
            # 32 MiB works on v5e/v6e/v7x; v5e/v6e may raise to 64 MiB with
            # larger block_b, v7x (64 MiB physical) should stay at 32 MiB.
            vmem_limit_bytes=32 * 1024 * 1024,
        ),
    )(xf, w1f, params["b1"], w2f, params["b2"],
      wf1f, params["bf1"], params["wf2"], params["bf2"])
    return out[:B]


def init_params(key):
    ks = jax.random.split(key, 8)
    s = 0.05
    # Conv weights stored (kh, kw, cin, cout) == torch conv.weight.permute(2,3,1,0).
    # fc1 weight pre-permuted to (h, w, cin, cout):
    #   wf1[h, w, c, o] == torch fc1.weight[o, c*4 + h*2 + w]
    # (torch's NCHW view(-1, 512) flatten order), so no runtime transpose is needed.
    # fc2 weight kept as a (1, 64) f32 row vector (VPU mul + lane reduce).
    return {
        "w1": (jax.random.normal(ks[0], (3, 3, 17, 64), jnp.float32) * s).astype(jnp.bfloat16),
        "b1": jax.random.normal(ks[1], (1, 64), jnp.float32) * s,
        "w2": (jax.random.normal(ks[2], (3, 3, 64, 128), jnp.float32) * s).astype(jnp.bfloat16),
        "b2": jax.random.normal(ks[3], (1, 128), jnp.float32) * s,
        "wf1": (jax.random.normal(ks[4], (2, 2, 128, 64), jnp.float32) * s).astype(jnp.bfloat16),
        "bf1": jax.random.normal(ks[5], (1, 64), jnp.float32) * s,
        "wf2": jax.random.normal(ks[6], (1, 64), jnp.float32) * s,
        "bf2": jax.random.normal(ks[7], (1, 1), jnp.float32) * s,
    }


# Pure-JAX reference (same weight layouts, f32 math) for a sanity check.
def _reference_forward(x_nchw, params):
    f32 = jnp.float32
    x = jnp.transpose(x_nchw, (0, 2, 3, 1)).astype(f32)                 # NHWC
    y = jax.lax.conv_general_dilated(
        x, params["w1"].astype(f32), (1, 1), "SAME",
        dimension_numbers=("NHWC", "HWIO", "NHWC"))
    y = jax.nn.relu(y + params["b1"][0])
    y = jax.lax.reduce_window(y, -jnp.inf, jax.lax.max,
                              (1, 2, 2, 1), (1, 2, 2, 1), "VALID")
    y = jax.lax.conv_general_dilated(
        y, params["w2"].astype(f32), (1, 1), "SAME",
        dimension_numbers=("NHWC", "HWIO", "NHWC"))
    y = jax.nn.relu(y + params["b2"][0])
    y = jax.lax.reduce_window(y, -jnp.inf, jax.lax.max,
                              (1, 2, 2, 1), (1, 2, 2, 1), "VALID")      # (B,2,2,128)
    flat = y.reshape(y.shape[0], 2 * 2 * 128)
    wf1 = params["wf1"].astype(f32).reshape(2 * 2 * 128, 64)
    z = jax.nn.relu(flat @ wf1 + params["bf1"][0])
    return jnp.tanh(z @ params["wf2"][0][:, None] + params["bf2"][0])


if __name__ == "__main__":
    key = jax.random.PRNGKey(0)
    pkey, xkey = jax.random.split(key)
    params = init_params(pkey)

    # Chess board input: batch=2, 17 planes, 8x8 board (NCHW like PyTorch).
    x = jax.random.normal(xkey, (2, 17, 8, 8), jnp.float32)

    fwd = jax.jit(lambda xx: chess_cnn_forward(xx, params))
    out = fwd(x)
    jax.block_until_ready(out)

    assert out.shape == (2, 1), out.shape
    assert out.dtype == jnp.float32
    assert bool(jnp.all(jnp.isfinite(out)))
    assert bool(jnp.all(jnp.abs(out) <= 1.0))          # tanh range

    ref = _reference_forward(x, params)
    assert bool(jnp.max(jnp.abs(out - ref)) < 3e-2), (out, ref)  # bf16-MXU tolerance

    print("KERNEL_OK")
</pallas_src>

<mosaic_0001>
module attributes {stable_mosaic.version = 11 : i64} {
  func.func @_chess_cnn_kernel(%arg0: i32, %arg1: memref<10x8x8x51xbf16, #tpu.memory_space<vmem>>, %arg2: memref<3x51x64xbf16, #tpu.memory_space<vmem>>, %arg3: memref<1x64xf32, #tpu.memory_space<vmem>>, %arg4: memref<3x192x128xbf16, #tpu.memory_space<vmem>>, %arg5: memref<1x128xf32, #tpu.memory_space<vmem>>, %arg6: memref<512x64xbf16, #tpu.memory_space<vmem>>, %arg7: memref<1x64xf32, #tpu.memory_space<vmem>>, %arg8: memref<1x64xf32, #tpu.memory_space<vmem>>, %arg9: memref<1x1xf32, #tpu.memory_space<vmem>>, %arg10: memref<8x1xf32, #tpu.memory_space<vmem>>) attributes {dimension_semantics = [#tpu.dimension_semantics<parallel>], iteration_bounds = array<i64: 1>, scalar_prefetch = 0 : i64, scratch_operands = 0 : i64, tpu.core_type = #tpu.core_type<tc>, window_params = [{transform_indices = @transform_0, window_bounds = array<i64: 10, 8, 8, 51>}, {pipeline_mode = #tpu.pipeline_mode<synchronous>, transform_indices = @transform_1, window_bounds = array<i64: 3, 51, 64>}, {pipeline_mode = #tpu.pipeline_mode<synchronous>, transform_indices = @transform_2, window_bounds = array<i64: 1, 64>}, {pipeline_mode = #tpu.pipeline_mode<synchronous>, transform_indices = @transform_3, window_bounds = array<i64: 3, 192, 128>}, {pipeline_mode = #tpu.pipeline_mode<synchronous>, transform_indices = @transform_4, window_bounds = array<i64: 1, 128>}, {pipeline_mode = #tpu.pipeline_mode<synchronous>, transform_indices = @transform_5, window_bounds = array<i64: 512, 64>}, {pipeline_mode = #tpu.pipeline_mode<synchronous>, transform_indices = @transform_6, window_bounds = array<i64: 1, 64>}, {pipeline_mode = #tpu.pipeline_mode<synchronous>, transform_indices = @transform_7, window_bounds = array<i64: 1, 64>}, {pipeline_mode = #tpu.pipeline_mode<synchronous>, transform_indices = @transform_8, window_bounds = array<i64: 1, 1>}, {transform_indices = @transform_9, window_bounds = array<i64: 8, 1>}]} {
    %c0 = arith.constant 0 : index
    %c0_0 = arith.constant 0 : index
    %c0_1 = arith.constant 0 : index
    %c0_2 = arith.constant 0 : index
    %0 = vector.load %arg1[%c0, %c0_0, %c0_1, %c0_2] : memref<10x8x8x51xbf16, #tpu.memory_space<vmem>>, vector<10x8x8x51xbf16>
    %1 = vector.extract_strided_slice %0 {offsets = [0, 0, 0, 0], sizes = [8, 8, 8, 51], strides = [1, 1, 1, 1]} : vector<10x8x8x51xbf16> to vector<8x8x8x51xbf16>
    %2 = vector.shape_cast %1 : vector<8x8x8x51xbf16> to vector<512x51xbf16>
    %c0_3 = arith.constant 0 : index
    %c0_4 = arith.constant 0 : index
    %c0_5 = arith.constant 0 : index
    %3 = vector.load %arg2[%c0_3, %c0_4, %c0_5] : memref<3x51x64xbf16, #tpu.memory_space<vmem>>, vector<1x51x64xbf16>
    %4 = vector.shape_cast %3 : vector<1x51x64xbf16> to vector<51x64xbf16>
    %cst = arith.constant dense<0.000000e+00> : vector<512x64xf32>
    %5 = tpu.matmul %2, %4, %cst {dimension_numbers = #tpu.dot_dimension_numbers<[1], [0], [0], [1], [0, 0, 1, 1], [], []>} : vector<512x51xbf16>, vector<51x64xbf16>, vector<512x64xf32> -> vector<512x64xf32>
    %6 = vector.extract_strided_slice %0 {offsets = [1, 0, 0, 0], sizes = [8, 8, 8, 51], strides = [1, 1, 1, 1]} : vector<10x8x8x51xbf16> to vector<8x8x8x51xbf16>
    %7 = vector.shape_cast %6 : vector<8x8x8x51xbf16> to vector<512x51xbf16>
    %c1 = arith.constant 1 : index
    %c0_6 = arith.constant 0 : index
    %c0_7 = arith.constant 0 : index
    %8 = vector.load %arg2[%c1, %c0_6, %c0_7] : memref<3x51x64xbf16, #tpu.memory_space<vmem>>, vector<1x51x64xbf16>
    %9 = vector.shape_cast %8 : vector<1x51x64xbf16> to vector<51x64xbf16>
    %cst_8 = arith.constant dense<0.000000e+00> : vector<512x64xf32>
    %10 = tpu.matmul %7, %9, %cst_8 {dimension_numbers = #tpu.dot_dimension_numbers<[1], [0], [0], [1], [0, 0, 1, 1], [], []>} : vector<512x51xbf16>, vector<51x64xbf16>, vector<512x64xf32> -> vector<512x64xf32>
    %11 = arith.addf %5, %10 : vector<512x64xf32>
    %12 = vector.extract_strided_slice %0 {offsets = [2, 0, 0, 0], sizes = [8, 8, 8, 51], strides = [1, 1, 1, 1]} : vector<10x8x8x51xbf16> to vector<8x8x8x51xbf16>
    %13 = vector.shape_cast %12 : vector<8x8x8x51xbf16> to vector<512x51xbf16>
    %c2 = arith.constant 2 : index
    %c0_9 = arith.constant 0 : index
    %c0_10 = arith.constant 0 : index
    %14 = vector.load %arg2[%c2, %c0_9, %c0_10] : memref<3x51x64xbf16, #tpu.memory_space<vmem>>, vector<1x51x64xbf16>
    %15 = vector.shape_cast %14 : vector<1x51x64xbf16> to vector<51x64xbf16>
    %cst_11 = arith.constant dense<0.000000e+00> : vector<512x64xf32>
    %16 = tpu.matmul %13, %15, %cst_11 {dimension_numbers = #tpu.dot_dimension_numbers<[1], [0], [0], [1], [0, 0, 1, 1], [], []>} : vector<512x51xbf16>, vector<51x64xbf16>, vector<512x64xf32> -> vector<512x64xf32>
    %17 = arith.addf %11, %16 : vector<512x64xf32>
    %c0_12 = arith.constant 0 : index
    %c0_13 = arith.constant 0 : index
    %18 = vector.load %arg3[%c0_12, %c0_13] : memref<1x64xf32, #tpu.memory_space<vmem>>, vector<1x64xf32>
    %19 = vector.broadcast %18 : vector<1x64xf32> to vector<512x64xf32>
    %20 = arith.addf %17, %19 : vector<512x64xf32>
    %cst_14 = arith.constant 0.000000e+00 : f32
    %21 = vector.broadcast %cst_14 : f32 to vector<512x64xf32>
    %22 = arith.maximumf %20, %21 : vector<512x64xf32>
    %23 = vector.shape_cast %22 : vector<512x64xf32> to vector<8x8x8x64xf32>
    %24 = vector.shape_cast %23 : vector<8x8x8x64xf32> to vector<4x2x8x8x64xf32>
    %25 = vector.extract_strided_slice %24 {offsets = [0, 0, 0, 0, 0], sizes = [4, 1, 8, 8, 64], strides = [1, 1, 1, 1, 1]} : vector<4x2x8x8x64xf32> to vector<4x1x8x8x64xf32>
    %26 = vector.shape_cast %25 : vector<4x1x8x8x64xf32> to vector<4x8x8x64xf32>
    %27 = vector.extract_strided_slice %24 {offsets = [0, 1, 0, 0, 0], sizes = [4, 1, 8, 8, 64], strides = [1, 1, 1, 1, 1]} : vector<4x2x8x8x64xf32> to vector<4x1x8x8x64xf32>
    %28 = vector.shape_cast %27 : vector<4x1x8x8x64xf32> to vector<4x8x8x64xf32>
    %29 = arith.maximumf %26, %28 : vector<4x8x8x64xf32>
    %30 = vector.shape_cast %29 : vector<4x8x8x64xf32> to vector<4x4x2x8x64xf32>
    %31 = vector.extract_strided_slice %30 {offsets = [0, 0, 0, 0, 0], sizes = [4, 4, 1, 8, 64], strides = [1, 1, 1, 1, 1]} : vector<4x4x2x8x64xf32> to vector<4x4x1x8x64xf32>
    %32 = vector.shape_cast %31 : vector<4x4x1x8x64xf32> to vector<4x4x8x64xf32>
    %33 = vector.extract_strided_slice %30 {offsets = [0, 0, 1, 0, 0], sizes = [4, 4, 1, 8, 64], strides = [1, 1, 1, 1, 1]} : vector<4x4x2x8x64xf32> to vector<4x4x1x8x64xf32>
    %34 = vector.shape_cast %33 : vector<4x4x1x8x64xf32> to vector<4x4x8x64xf32>
    %35 = arith.maximumf %32, %34 : vector<4x4x8x64xf32>
    %36 = arith.truncf %35 : vector<4x4x8x64xf32> to vector<4x4x8x64xbf16>
    %cst_15 = arith.constant 0.000000e+00 : bf16
    %37 = vector.broadcast %cst_15 : bf16 to vector<1x4x8x64xbf16>
    %38 = tpu.concatenate %37, %36, %37 in 0 : vector<1x4x8x64xbf16>, vector<4x4x8x64xbf16>, vector<1x4x8x64xbf16> -> vector<6x4x8x64xbf16>
    %cst_16 = arith.constant 0.000000e+00 : bf16
    %39 = vector.broadcast %cst_16 : bf16 to vector<6x1x8x64xbf16>
    %40 = tpu.concatenate %39, %38, %39 in 1 : vector<6x1x8x64xbf16>, vector<6x4x8x64xbf16>, vector<6x1x8x64xbf16> -> vector<6x6x8x64xbf16>
    %41 = vector.extract_strided_slice %40 {offsets = [0, 0, 0, 0], sizes = [6, 4, 8, 64], strides = [1, 1, 1, 1]} : vector<6x6x8x64xbf16> to vector<6x4x8x64xbf16>
    %42 = vector.extract_strided_slice %40 {offsets = [0, 1, 0, 0], sizes = [6, 4, 8, 64], strides = [1, 1, 1, 1]} : vector<6x6x8x64xbf16> to vector<6x4x8x64xbf16>
    %43 = vector.extract_strided_slice %40 {offsets = [0, 2, 0, 0], sizes = [6, 4, 8, 64], strides = [1, 1, 1, 1]} : vector<6x6x8x64xbf16> to vector<6x4x8x64xbf16>
    %44 = tpu.concatenate %41, %42, %43 in 3 : vector<6x4x8x64xbf16>, vector<6x4x8x64xbf16>, vector<6x4x8x64xbf16> -> vector<6x4x8x192xbf16>
    %45 = vector.extract_strided_slice %44 {offsets = [0, 0, 0, 0], sizes = [4, 4, 8, 192], strides = [1, 1, 1, 1]} : vector<6x4x8x192xbf16> to vector<4x4x8x192xbf16>
    %46 = vector.shape_cast %45 : vector<4x4x8x192xbf16> to vector<128x192xbf16>
    %c0_17 = arith.constant 0 : index
    %c0_18 = arith.constant 0 : index
    %c0_19 = arith.constant 0 : index
    %47 = vector.load %arg4[%c0_17, %c0_18, %c0_19] : memref<3x192x128xbf16, #tpu.memory_space<vmem>>, vector<1x192x128xbf16>
    %48 = vector.shape_cast %47 : vector<1x192x128xbf16> to vector<192x128xbf16>
    %cst_20 = arith.constant dense<0.000000e+00> : vector<128x128xf32>
    %49 = tpu.matmul %46, %48, %cst_20 {dimension_numbers = #tpu.dot_dimension_numbers<[1], [0], [0], [1], [0, 0, 1, 1], [], []>} : vector<128x192xbf16>, vector<192x128xbf16>, vector<128x128xf32> -> vector<128x128xf32>
    %50 = vector.extract_strided_slice %44 {offsets = [1, 0, 0, 0], sizes = [4, 4, 8, 192], strides = [1, 1, 1, 1]} : vector<6x4x8x192xbf16> to vector<4x4x8x192xbf16>
    %51 = vector.shape_cast %50 : vector<4x4x8x192xbf16> to vector<128x192xbf16>
    %c1_21 = arith.constant 1 : index
    %c0_22 = arith.constant 0 : index
    %c0_23 = arith.constant 0 : index
    %52 = vector.load %arg4[%c1_21, %c0_22, %c0_23] : memref<3x192x128xbf16, #tpu.memory_space<vmem>>, vector<1x192x128xbf16>
    %53 = vector.shape_cast %52 : vector<1x192x128xbf16> to vector<192x128xbf16>
    %cst_24 = arith.constant dense<0.000000e+00> : vector<128x128xf32>
    %54 = tpu.matmul %51, %53, %cst_24 {dimension_numbers = #tpu.dot_dimension_numbers<[1], [0], [0], [1], [0, 0, 1, 1], [], []>} : vector<128x192xbf16>, vector<192x128xbf16>, vector<128x128xf32> -> vector<128x128xf32>
    %55 = arith.addf %49, %54 : vector<128x128xf32>
    %56 = vector.extract_strided_slice %44 {offsets = [2, 0, 0, 0], sizes = [4, 4, 8, 192], strides = [1, 1, 1, 1]} : vector<6x4x8x192xbf16> to vector<4x4x8x192xbf16>
    %57 = vector.shape_cast %56 : vector<4x4x8x192xbf16> to vector<128x192xbf16>
    %c2_25 = arith.constant 2 : index
    %c0_26 = arith.constant 0 : index
    %c0_27 = arith.constant 0 : index
    %58 = vector.load %arg4[%c2_25, %c0_26, %c0_27] : memref<3x192x128xbf16, #tpu.memory_space<vmem>>, vector<1x192x128xbf16>
    %59 = vector.shape_cast %58 : vector<1x192x128xbf16> to vector<192x128xbf16>
    %cst_28 = arith.constant dense<0.000000e+00> : vector<128x128xf32>
    %60 = tpu.matmul %57, %59, %cst_28 {dimension_numbers = #tpu.dot_dimension_numbers<[1], [0], [0], [1], [0, 0, 1, 1], [], []>} : vector<128x192xbf16>, vector<192x128xbf16>, vector<128x128xf32> -> vector<128x128xf32>
    %61 = arith.addf %55, %60 : vector<128x128xf32>
    %c0_29 = arith.constant 0 : index
    %c0_30 = arith.constant 0 : index
    %62 = vector.load %arg5[%c0_29, %c0_30] : memref<1x128xf32, #tpu.memory_space<vmem>>, vector<1x128xf32>
    %63 = vector.broadcast %62 : vector<1x128xf32> to vector<128x128xf32>
    %64 = arith.addf %61, %63 : vector<128x128xf32>
    %cst_31 = arith.constant 0.000000e+00 : f32
    %65 = vector.broadcast %cst_31 : f32 to vector<128x128xf32>
    %66 = arith.maximumf %64, %65 : vector<128x128xf32>
    %67 = vector.shape_cast %66 : vector<128x128xf32> to vector<4x4x8x128xf32>
    %68 = vector.shape_cast %67 : vector<4x4x8x128xf32> to vector<2x2x4x8x128xf32>
    %69 = vector.extract_strided_slice %68 {offsets = [0, 0, 0, 0, 0], sizes = [2, 1, 4, 8, 128], strides = [1, 1, 1, 1, 1]} : vector<2x2x4x8x128xf32> to vector<2x1x4x8x128xf32>
    %70 = vector.shape_cast %69 : vector<2x1x4x8x128xf32> to vector<2x4x8x128xf32>
    %71 = vector.extract_strided_slice %68 {offsets = [0, 1, 0, 0, 0], sizes = [2, 1, 4, 8, 128], strides = [1, 1, 1, 1, 1]} : vector<2x2x4x8x128xf32> to vector<2x1x4x8x128xf32>
    %72 = vector.shape_cast %71 : vector<2x1x4x8x128xf32> to vector<2x4x8x128xf32>
    %73 = arith.maximumf %70, %72 : vector<2x4x8x128xf32>
    %74 = vector.shape_cast %73 : vector<2x4x8x128xf32> to vector<2x2x2x8x128xf32>
    %75 = vector.extract_strided_slice %74 {offsets = [0, 0, 0, 0, 0], sizes = [2, 2, 1, 8, 128], strides = [1, 1, 1, 1, 1]} : vector<2x2x2x8x128xf32> to vector<2x2x1x8x128xf32>
    %76 = vector.shape_cast %75 : vector<2x2x1x8x128xf32> to vector<2x2x8x128xf32>
    %77 = vector.extract_strided_slice %74 {offsets = [0, 0, 1, 0, 0], sizes = [2, 2, 1, 8, 128], strides = [1, 1, 1, 1, 1]} : vector<2x2x2x8x128xf32> to vector<2x2x1x8x128xf32>
    %78 = vector.shape_cast %77 : vector<2x2x1x8x128xf32> to vector<2x2x8x128xf32>
    %79 = arith.maximumf %76, %78 : vector<2x2x8x128xf32>
    %80 = vector.extract_strided_slice %79 {offsets = [0, 0, 0, 0], sizes = [1, 1, 8, 128], strides = [1, 1, 1, 1]} : vector<2x2x8x128xf32> to vector<1x1x8x128xf32>
    %81 = vector.shape_cast %80 : vector<1x1x8x128xf32> to vector<8x128xf32>
    %82 = vector.extract_strided_slice %79 {offsets = [0, 1, 0, 0], sizes = [1, 1, 8, 128], strides = [1, 1, 1, 1]} : vector<2x2x8x128xf32> to vector<1x1x8x128xf32>
    %83 = vector.shape_cast %82 : vector<1x1x8x128xf32> to vector<8x128xf32>
    %84 = vector.extract_strided_slice %79 {offsets = [1, 0, 0, 0], sizes = [1, 1, 8, 128], strides = [1, 1, 1, 1]} : vector<2x2x8x128xf32> to vector<1x1x8x128xf32>
    %85 = vector.shape_cast %84 : vector<1x1x8x128xf32> to vector<8x128xf32>
    %86 = vector.extract_strided_slice %79 {offsets = [1, 1, 0, 0], sizes = [1, 1, 8, 128], strides = [1, 1, 1, 1]} : vector<2x2x8x128xf32> to vector<1x1x8x128xf32>
    %87 = vector.shape_cast %86 : vector<1x1x8x128xf32> to vector<8x128xf32>
    %88 = tpu.concatenate %81, %83, %85, %87 in 1 : vector<8x128xf32>, vector<8x128xf32>, vector<8x128xf32>, vector<8x128xf32> -> vector<8x512xf32>
    %89 = arith.truncf %88 : vector<8x512xf32> to vector<8x512xbf16>
    %c0_32 = arith.constant 0 : index
    %c0_33 = arith.constant 0 : index
    %90 = vector.load %arg6[%c0_32, %c0_33] : memref<512x64xbf16, #tpu.memory_space<vmem>>, vector<512x64xbf16>
    %cst_34 = arith.constant dense<0.000000e+00> : vector<8x64xf32>
    %91 = tpu.matmul %89, %90, %cst_34 {dimension_numbers = #tpu.dot_dimension_numbers<[1], [0], [0], [1], [0, 0, 1, 1], [], []>} : vector<8x512xbf16>, vector<512x64xbf16>, vector<8x64xf32> -> vector<8x64xf32>
    %c0_35 = arith.constant 0 : index
    %c0_36 = arith.constant 0 : index
    %92 = vector.load %arg7[%c0_35, %c0_36] : memref<1x64xf32, #tpu.memory_space<vmem>>, vector<1x64xf32>
    %93 = vector.broadcast %92 : vector<1x64xf32> to vector<8x64xf32>
    %94 = arith.addf %91, %93 : vector<8x64xf32>
    %cst_37 = arith.constant 0.000000e+00 : f32
    %95 = vector.broadcast %cst_37 : f32 to vector<8x64xf32>
    %96 = arith.maximumf %94, %95 : vector<8x64xf32>
    %c0_38 = arith.constant 0 : index
    %c0_39 = arith.constant 0 : index
    %97 = vector.load %arg8[%c0_38, %c0_39] : memref<1x64xf32, #tpu.memory_space<vmem>>, vector<1x64xf32>
    %98 = vector.broadcast %97 : vector<1x64xf32> to vector<8x64xf32>
    %99 = arith.mulf %96, %98 : vector<8x64xf32>
    %cst_40 = arith.constant dense<0.000000e+00> : vector<8xf32>
    %100 = vector.multi_reduction <add>, %99, %cst_40 [1] : vector<8x64xf32> to vector<8xf32>
    %101 = vector.shape_cast %100 : vector<8xf32> to vector<8x1xf32>
    %c0_41 = arith.constant 0 : index
    %c0_42 = arith.constant 0 : index
    %102 = vector.load %arg9[%c0_41, %c0_42] : memref<1x1xf32, #tpu.memory_space<vmem>>, vector<1x1xf32>
    %103 = vector.broadcast %102 : vector<1x1xf32> to vector<8x1xf32>
    %104 = arith.addf %101, %103 : vector<8x1xf32>
    %105 = math.tanh %104 : vector<8x1xf32>
    %c0_43 = arith.constant 0 : index
    %c0_44 = arith.constant 0 : index
    %106 = vector.load %arg10[%c0_43, %c0_44] : memref<8x1xf32, #tpu.memory_space<vmem>>, vector<8x1xf32>
    tpu.vector_store %arg10[%c0_43, %c0_44], %105 {strides = array<i32>} : memref<8x1xf32, #tpu.memory_space<vmem>>, vector<8x1xf32>,
    return
  }
  func.func @transform_0(%arg0: i32) -> (i32, i32, i32, i32) {
    %c0_i32 = arith.constant 0 : i32
    %c0_i32_0 = arith.constant 0 : i32
    %c0_i32_1 = arith.constant 0 : i32
    %c0_i32_2 = arith.constant 0 : i32
    return %c0_i32, %c0_i32_0, %arg0, %c0_i32_1 : i32, i32, i32, i32
  }
  func.func @transform_1(%arg0: i32) -> (i32, i32, i32) {
    %c0_i32 = arith.constant 0 : i32
    %c0_i32_0 = arith.constant 0 : i32
    %c0_i32_1 = arith.constant 0 : i32
    %c0_i32_2 = arith.constant 0 : i32
    return %c0_i32, %c0_i32_0, %c0_i32_1 : i32, i32, i32
  }
  func.func @transform_2(%arg0: i32) -> (i32, i32) {
    %c0_i32 = arith.constant 0 : i32
    %c0_i32_0 = arith.constant 0 : i32
    %c0_i32_1 = arith.constant 0 : i32
    return %c0_i32, %c0_i32_0 : i32, i32
  }
  func.func @transform_3(%arg0: i32) -> (i32, i32, i32) {
    %c0_i32 = arith.constant 0 : i32
    %c0_i32_0 = arith.constant 0 : i32
    %c0_i32_1 = arith.constant 0 : i32
    %c0_i32_2 = arith.constant 0 : i32
    return %c0_i32, %c0_i32_0, %c0_i32_1 : i32, i32, i32
  }
  func.func @transform_4(%arg0: i32) -> (i32, i32) {
    %c0_i32 = arith.constant 0 : i32
    %c0_i32_0 = arith.constant 0 : i32
    %c0_i32_1 = arith.constant 0 : i32
    return %c0_i32, %c0_i32_0 : i32, i32
  }
  func.func @transform_5(%arg0: i32) -> (i32, i32) {
    %c0_i32 = arith.constant 0 : i32
    %c0_i32_0 = arith.constant 0 : i32
    %c0_i32_1 = arith.constant 0 : i32
    return %c0_i32, %c0_i32_0 : i32, i32
  }
  func.func @transform_6(%arg0: i32) -> (i32, i32) {
    %c0_i32 = arith.constant 0 : i32
    %c0_i32_0 = arith.constant 0 : i32
    %c0_i32_1 = arith.constant 0 : i32
    return %c0_i32, %c0_i32_0 : i32, i32
  }
  func.func @transform_7(%arg0: i32) -> (i32, i32) {
    %c0_i32 = arith.constant 0 : i32
    %c0_i32_0 = arith.constant 0 : i32
    %c0_i32_1 = arith.constant 0 : i32
    return %c0_i32, %c0_i32_0 : i32, i32
  }
  func.func @transform_8(%arg0: i32) -> (i32, i32) {
    %c0_i32 = arith.constant 0 : i32
    %c0_i32_0 = arith.constant 0 : i32
    %c0_i32_1 = arith.constant 0 : i32
    return %c0_i32, %c0_i32_0 : i32, i32
  }
  func.func @transform_9(%arg0: i32) -> (i32, i32) {
    %c0_i32 = arith.constant 0 : i32
    %c0_i32_0 = arith.constant 0 : i32
    return %arg0, %c0_i32 : i32, i32
  }
}

</mosaic_0001>

<bundles_post_ra>
// kernel: _lambda_.1
= control target key start
LH: loop header
LB: loop body
LE: loop exit
PB: predicated region body
PF: predicated region fallthrough
CT: control target
= control target key end

     0   :  { %vm408_vm0 = vcmask 1040384   ;;  %vm409_vm1 = vcmask 1041408   ;;  %v3709_v1 = vmov 65535   ;;  %vm311_vm2 = vcmask 416768   ;;  %s5040_s1 = inlined_call_operand.vmem [shape: bf16[3,51,64], index: 1, kind: input, shape index: {}]   ;;  %s5041_s0 = inlined_call_operand.vmem [shape: bf16[10,8,8,51], index: 0, kind: input, shape index: {}]   ;;  %s5042_s3 = inlined_call_operand.vmem [shape: bf16[3,192,128], index: 3, kind: input, shape index: {}]   ;;  %s5043_s2 = inlined_call_operand.vmem [shape: f32[1,64], index: 2, kind: input, shape index: {}]   ;;  %s5044_s5 = inlined_call_operand.vmem [shape: bf16[512,64], index: 5, kind: input, shape index: {}]   ;;  %s5045_s4 = inlined_call_operand.vmem [shape: f32[1,128], index: 4, kind: input, shape index: {}]   ;;  %s5046_s8 = inlined_call_operand.<no memory space> [shape: f32[1,1], index: 8, kind: input, shape index: {}]   ;;  %s5047_s6 = inlined_call_operand.vmem [shape: f32[1,64], index: 6, kind: input, shape index: {}]   ;;  %s5048_s7 = inlined_call_operand.vmem [shape: f32[1,64], index: 7, kind: input, shape index: {}]   ;;  %s5049_s9 = inlined_call_operand.vmem [shape: f32[8,1], index: 9, kind: output, shape index: {}]  }
   0x1   :  { %v3587_v0 = vld [vmem:[%s5040_s1 + $0x34] ss:$0 sps:$4 sm:$0x33]   ;;  %v410_v2 = vsel %vm408_vm0, 4294967295, %v3709_v1  ;;  %v3589_v6 = vld [vmem:[%s5040_s1 + $0x2c] sm:$0xff]   ;;  %v3591_v9 = vld [vmem:[%s5040_s1 + $0x24] sm:$0xff]  }
   0x2   :  { %v411_v3 = vsel %vm409_vm1, %v410_v2, 0  ;;  %v3588_v4 = vld [vmem:[%s5040_s1 + $0x18] ss:$0 sps:$4 sm:$0x33]   ;;  %v3590_v8 = vld [vmem:[%s5040_s1 + $0x10] sm:$0xff]   ;;  %v3592_v10 = vld [vmem:[%s5040_s1 + $0x8] sm:$0xff]  }
   0x3   :  { %v413_v5 = vand.u32 %v3587_v0, %v411_v3  ;;  %v758_v7 = vand.u32 %v3588_v4, %v411_v3  ;;  %v3595_v11 = vld [vmem:[%s5041_s0 + $0x20] sm:$0xff]   ;;  %v3599_v15 = vld [vmem:[%s5040_s1 + $0x50] ss:$0 sps:$4 sm:$0x33]   ;;  %v3597_v17 = vld [vmem:[%s5041_s0 + $0x28] sm:$0xff]   ;;  %vm1716_vm3 = vcmask 523264  }
   0x4   :  { %v3596_v12 = vld [vmem:[%s5041_s0] sm:$0xff]   ;;  %3376 = vmatprep.mubr.msk.bf16.mxu0 %vm311_vm2, %v3595_v11  ;;  %v1111_v16 = vand.u32 %v3599_v15, %v411_v3  ;;  %v3598_v18 = vld [vmem:[%s5041_s0 + $0x8] sm:$0xff]   ;;  %v3600_v19 = vld [vmem:[%s5041_s0 + $0x30] sm:$0xff]   ;;  %vm2881_vm4 = vcmask 7168  }
   0x5   :  { %3368 = vmatprep.subr.bf16.mxu0 %v413_v5  ;;  %3440 = vmatprep.subr.bf16.mxu1 %v758_v7  ;;  %v3593_v13 = vld [vmem:[%s5040_s1 + $0x1c] sm:$0xff]   ;;  %v3601_v20 = vld [vmem:[%s5041_s0 + $0x10] sm:$0xff]   ;;  %v3610_v22 = vld [vmem:[%s5040_s1 + $0x48] sm:$0xff]  }
   0x6   :  { %3369 = vmatpush3.bf16.msra.mxu0 %v413_v5  ;;  %3441 = vmatpush3.bf16.msra.mxu1 %v758_v7  ;;  %v3594_v14 = vld [vmem:[%s5040_s1] sm:$0xff]   ;;  %v3602_v21 = vld [vmem:[%s5041_s0 + $0x38] sm:$0xff]   ;;  %v3835_v25 = vld [vmem:[%s5041_s0 + $0x48] sm:$0xff]  }
   0x7   :  { %3370 = vmatprep.subr.bf16.mxu0 %v3589_v6  ;;  %3442 = vmatprep.subr.bf16.mxu1 %v3590_v8  ;;  %v3603_v23 = vld [vmem:[%s5041_s0 + $0x18] sm:$0xff]   ;;  %v3825_v24 = vld [vmem:[%s5041_s0 + $0x40] sm:$0xff]   ;;  %v3843_v27 = vld [vmem:[%s5041_s0 + $0x50] sm:$0xff]  }
   0x8   :  { %3448 = vmatprep.mubr.msk.bf16.mxu1 %vm311_vm2, %v3596_v12  ;;  %v3619_v26 = vld [vmem:[%s5040_s1 + $0x40] sm:$0xff]   ;;  %v3854_v28 = vld [vmem:[%s5041_s0 + $0x58] sm:$0xff]   ;;  %v3874_v31 = vld [vmem:[%s5041_s0 + $0x68] sm:$0xff]  }
   0x9   :  { %v3859_v29 = vld [vmem:[%s5041_s0 + $0x60] sm:$0xff]   ;;  %v3628_v30 = vld [vmem:[%s5040_s1 + $0x38] sm:$0xff]   ;;  %v3879_v32 = vld [vmem:[%s5041_s0 + $0x70] sm:$0xff]   ;;  %s3711_s1 = smov 64  }
   0xa   :  { %3371 = vmatpush3.bf16.msra.mxu0 %v3589_v6  ;;  %3443 = vmatpush3.bf16.msra.mxu1 %v3590_v8  ;;  %v3892_v33 = vld [vmem:[%s5041_s0 + $0x78] sm:$0xff]   ;;  %v3897_v34 = vld [vmem:[%s5041_s0 + $0x80] sm:$0xff]   ;;  %v3910_v35 = vld [vmem:[%s5041_s0 + $0x88] sm:$0xff]  }
   0xb   :  { %3372 = vmatprep.subr.bf16.mxu0 %v3591_v9  ;;  %3444 = vmatprep.subr.bf16.mxu1 %v3592_v10  ;;  %v3915_v36 = vld [vmem:[%s5041_s0 + $0x90] sm:$0xff]   ;;  %v3616_v37 = vld [vmem:[%s5041_s0 + $0x98] sm:$0xff]   ;;  %v3617_v38 = vld [vmem:[%s5041_s0 + $0xa0] sm:$0xff]  }
   0xc   :  { %v3618_v39 = vld [vmem:[%s5041_s0 + $0xa8] sm:$0xff]   ;;  %v3620_v40 = vld [vmem:[%s5041_s0 + $0xb0] sm:$0xff]   ;;  %v3621_v41 = vld [vmem:[%s5041_s0 + $0xb8] sm:$0xff]  }
   0xd   :  { %v3622_v42 = vld [vmem:[%s5041_s0 + $0xc0] sm:$0xff]   ;;  %v3623_v43 = vld [vmem:[%s5041_s0 + $0xc8] sm:$0xff]   ;;  %v3624_v44 = vld [vmem:[%s5041_s0 + $0xd0] sm:$0xff]  }
   0xe   :  { %3373 = vmatpush3.bf16.msra.mxu0 %v3591_v9  ;;  %3445 = vmatpush3.bf16.msra.mxu1 %v3592_v10  ;;  %v3625_v45 = vld [vmem:[%s5041_s0 + $0xd8] sm:$0xff]   ;;  %v3626_v46 = vld [vmem:[%s5041_s0 + $0xe0] sm:$0xff]   ;;  %v3627_v47 = vld [vmem:[%s5041_s0 + $0xe8] sm:$0xff]  }
   0xf   :  { %3374 = vmatprep.subr.bf16.mxu0 %v3593_v13  ;;  %3446 = vmatprep.subr.bf16.mxu1 %v3594_v14  ;;  %v3629_v48 = vld [vmem:[%s5041_s0 + $0xf0] sm:$0xff]   ;;  %v3630_v49 = vld [vmem:[%s5041_s0 + $0xf8] sm:$0xff]   ;;  %v3631_v50 = vld [vmem:[%s5041_s0 + $0x100] sm:$0xff]  }
  0x10   :  { %v3632_v51 = vld [vmem:[%s5041_s0 + $0x108] sm:$0xff]   ;;  %v3633_v52 = vld [vmem:[%s5041_s0 + $0x110] sm:$0xff]   ;;  %v4012_v53 = vld [vmem:[%s5041_s0 + $0x118] sm:$0xff]  }
  0x12   :  { %3375 = vmatpush3.bf16.msra.mxu0 %v3593_v13  ;;  %3447 = vmatpush3.bf16.msra.mxu1 %v3594_v14 }
  0x13   :  { %3512 = vmatprep.subr.bf16.mxu0 %v1111_v16 }
  0x15   :  { %3377 = vmatmul.mubr.msk.bf16.vlgmr.msra.gmra.mxu0 %vm311_vm2, %v3597_v17  ;;  %3449 = vmatmul.mubr.msk.bf16.vlgmr.msra.gmra.mxu1 %vm311_vm2, %v3598_v18 }
  0x16   :  { %3513 = vmatpush3.bf16.msra.mxu0 %v1111_v16  ;;  %3380 = vmatprep.mubr.msk.bf16.mxu0 %vm311_vm2, %v3600_v19 }
  0x17   :  { %3452 = vmatprep.mubr.msk.bf16.mxu1 %vm311_vm2, %v3601_v20  ;;  %3514 = vmatprep.subr.bf16.mxu0 %v3610_v22  ;;  %v3635_v20 = vld [vmem:[%s5041_s0 + $0x120] sm:$0xff]  }
  0x1a   :  { %3515 = vmatpush3.bf16.msra.mxu0 %v3610_v22 }
  0x1b   :  { %3516 = vmatprep.subr.bf16.mxu0 %v3619_v26 }
  0x1d   :  { %3381 = vmatmul.mubr.msk.bf16.gmra.mxu0 %vm311_vm2, %v3602_v21  ;;  %3453 = vmatmul.mubr.msk.bf16.gmra.mxu1 %vm311_vm2, %v3603_v23 }
  0x1e   :  { %3384 = vmatprep.mubr.msk.bf16.mxu0 %vm311_vm2, %v3825_v24  ;;  %3456 = vmatprep.mubr.msk.bf16.mxu1 %vm311_vm2, %v3595_v11 }
  0x1f   :  { %3517 = vmatpush3.bf16.msra.mxu0 %v3619_v26 }
  0x20   :  { %3518 = vmatprep.subr.bf16.mxu0 %v3628_v30 }
  0x23   :  { %3519 = vmatpush3.bf16.msra.mxu0 %v3628_v30 }
  0x25   :  { %3385 = vmatmul.mubr.msk.bf16.gmra.mxu0 %vm311_vm2, %v3835_v25  ;;  %3457 = vmatmul.mubr.msk.bf16.gmra.mxu1 %vm311_vm2, %v3597_v17 }
  0x26   :  { %3388 = vmatprep.mubr.msk.bf16.mxu0 %vm311_vm2, %v3843_v27  ;;  %3460 = vmatprep.mubr.msk.bf16.mxu1 %vm311_vm2, %v3600_v19 }
  0x2d   :  { %3389 = vmatmul.mubr.msk.bf16.gmra.mxu0 %vm311_vm2, %v3854_v28  ;;  %3461 = vmatmul.mubr.msk.bf16.gmra.mxu1 %vm311_vm2, %v3602_v21 }
  0x2e   :  { %3392 = vmatprep.mubr.msk.bf16.mxu0 %vm311_vm2, %v3859_v29  ;;  %3464 = vmatprep.mubr.msk.bf16.mxu1 %vm311_vm2, %v3825_v24 }
  0x35   :  { %3393 = vmatmul.mubr.msk.bf16.gmra.mxu0 %vm311_vm2, %v3874_v31  ;;  %3465 = vmatmul.mubr.msk.bf16.gmra.mxu1 %vm311_vm2, %v3835_v25 }
  0x36   :  { %3396 = vmatprep.mubr.msk.bf16.mxu0 %vm311_vm2, %v3879_v32  ;;  %3468 = vmatprep.mubr.msk.bf16.mxu1 %vm311_vm2, %v3843_v27 }
  0x3d   :  { %3397 = vmatmul.mubr.msk.bf16.gmra.mxu0 %vm311_vm2, %v3892_v33  ;;  %3469 = vmatmul.mubr.msk.bf16.gmra.mxu1 %vm311_vm2, %v3854_v28 }
  0x3e   :  { %3400 = vmatprep.mubr.msk.bf16.mxu0 %vm311_vm2, %v3897_v34  ;;  %3472 = vmatprep.mubr.msk.bf16.mxu1 %vm311_vm2, %v3859_v29 }
  0x45   :  { %3401 = vmatmul.mubr.msk.bf16.gmra.mxu0 %vm311_vm2, %v3910_v35  ;;  %3473 = vmatmul.mubr.msk.bf16.gmra.mxu1 %vm311_vm2, %v3874_v31 }
  0x46   :  { %3404 = vmatprep.mubr.msk.bf16.mxu0 %vm311_vm2, %v3915_v36  ;;  %3476 = vmatprep.mubr.msk.bf16.mxu1 %vm311_vm2, %v3879_v32 }
  0x4d   :  { %3405 = vmatmul.mubr.msk.bf16.gmra.mxu0 %vm311_vm2, %v3616_v37  ;;  %3477 = vmatmul.mubr.msk.bf16.gmra.mxu1 %vm311_vm2, %v3892_v33 }
  0x4e   :  { %3408 = vmatprep.mubr.msk.bf16.mxu0 %vm311_vm2, %v3617_v38  ;;  %3480 = vmatprep.mubr.msk.bf16.mxu1 %vm311_vm2, %v3897_v34 }
  0x55   :  { %3409 = vmatmul.mubr.msk.bf16.gmra.mxu0 %vm311_vm2, %v3618_v39  ;;  %3481 = vmatmul.mubr.msk.bf16.gmra.mxu1 %vm311_vm2, %v3910_v35 }
  0x56   :  { %3412 = vmatprep.mubr.msk.bf16.mxu0 %vm311_vm2, %v3620_v40  ;;  %3484 = vmatprep.mubr.msk.bf16.mxu1 %vm311_vm2, %v3915_v36 }
  0x5d   :  { %3413 = vmatmul.mubr.msk.bf16.gmra.mxu0 %vm311_vm2, %v3621_v41  ;;  %3485 = vmatmul.mubr.msk.bf16.gmra.mxu1 %vm311_vm2, %v3616_v37 }
  0x5e   :  { %3416 = vmatprep.mubr.msk.bf16.mxu0 %vm311_vm2, %v3622_v42  ;;  %3488 = vmatprep.mubr.msk.bf16.mxu1 %vm311_vm2, %v3617_v38 }
  0x65   :  { %3417 = vmatmul.mubr.msk.bf16.gmra.mxu0 %vm311_vm2, %v3623_v43  ;;  %3489 = vmatmul.mubr.msk.bf16.gmra.mxu1 %vm311_vm2, %v3618_v39 }
  0x66   :  { %3420 = vmatprep.mubr.msk.bf16.mxu0 %vm311_vm2, %v3624_v44  ;;  %3492 = vmatprep.mubr.msk.bf16.mxu1 %vm311_vm2, %v3620_v40 }
  0x6d   :  { %3421 = vmatmul.mubr.msk.bf16.gmra.mxu0 %vm311_vm2, %v3625_v45  ;;  %3493 = vmatmul.mubr.msk.bf16.gmra.mxu1 %vm311_vm2, %v3621_v41 }
  0x6e   :  { %3424 = vmatprep.mubr.msk.bf16.mxu0 %vm311_vm2, %v3626_v46  ;;  %3496 = vmatprep.mubr.msk.bf16.mxu1 %vm311_vm2, %v3622_v42 }
  0x75   :  { %3425 = vmatmul.mubr.msk.bf16.gmra.mxu0 %vm311_vm2, %v3627_v47  ;;  %3497 = vmatmul.mubr.msk.bf16.gmra.mxu1 %vm311_vm2, %v3623_v43 }
  0x76   :  { %3428 = vmatprep.mubr.msk.bf16.mxu0 %vm311_vm2, %v3629_v48  ;;  %3500 = vmatprep.mubr.msk.bf16.mxu1 %vm311_vm2, %v3624_v44 }
  0x7d   :  { %3429 = vmatmul.mubr.msk.bf16.gmra.mxu0 %vm311_vm2, %v3630_v49  ;;  %3501 = vmatmul.mubr.msk.bf16.gmra.mxu1 %vm311_vm2, %v3625_v45 }
  0x7e   :  { %3432 = vmatprep.mubr.msk.bf16.mxu0 %vm311_vm2, %v3631_v50  ;;  %3504 = vmatprep.mubr.msk.bf16.mxu1 %vm311_vm2, %v3626_v46 }
  0x85   :  { %3433 = vmatmul.mubr.msk.bf16.gmra.mxu0 %vm311_vm2, %v3632_v51  ;;  %3505 = vmatmul.mubr.msk.bf16.gmra.mxu1 %vm311_vm2, %v3627_v47 }
  0x86   :  { %3436 = vmatprep.mubr.msk.bf16.mxu0 %vm311_vm2, %v3633_v52  ;;  %3508 = vmatprep.mubr.msk.bf16.mxu1 %vm311_vm2, %v3629_v48 }
  0x8d   :  { %3437 = vmatmul.mubr.msk.bf16.gmra.mxu0 %vm311_vm2, %v4012_v53  ;;  %3509 = vmatmul.mubr.msk.bf16.gmra.mxu1 %vm311_vm2, %v3630_v49 }
  0x8e   :  { %3520 = vmatprep.mubr.msk.bf16.mxu0 %vm311_vm2, %v3825_v24 }
  0x95   :  { %3521 = vmatmul.mubr.msk.bf16.vlgmr.msra.gmra.mxu0 %vm311_vm2, %v3835_v25  ;;  %v5050_v25 = vmov 0  }
  0x96   :  { %3524 = vmatprep.mubr.msk.bf16.mxu0 %vm311_vm2, %v3843_v27  ;;  %1980 = vmatprep.subr.bf16.mxu1 %v5050_v25  ;;  %v3636_v27 = vld [vmem:[%s5041_s0 + $0x128] sm:$0xff]  }
  0x97   :  { %2349 = vmatprep.subr.bf16.mxu0 %v5050_v25 }
  0x9d   :  { %3525 = vmatmul.mubr.msk.bf16.gmra.mxu0 %vm311_vm2, %v3854_v28 }
  0x9e   :  { %3528 = vmatprep.mubr.msk.bf16.mxu0 %vm311_vm2, %v3859_v29  ;;  %v3637_v29 = vld [vmem:[%s5041_s0 + $0x130] sm:$0xff]  }
  0xa5   :  { %3529 = vmatmul.mubr.msk.bf16.gmra.mxu0 %vm311_vm2, %v3874_v31 }
  0xa6   :  { %3532 = vmatprep.mubr.msk.bf16.mxu0 %vm311_vm2, %v3879_v32 }
  0xad   :  { %3533 = vmatmul.mubr.msk.bf16.gmra.mxu0 %vm311_vm2, %v3892_v33 }
  0xae   :  { %3536 = vmatprep.mubr.msk.bf16.mxu0 %vm311_vm2, %v3897_v34 }
  0xb5   :  { %3537 = vmatmul.mubr.msk.bf16.gmra.mxu0 %vm311_vm2, %v3910_v35  ;;  %v3638_v35 = vld [vmem:[%s5041_s0 + $0x138] sm:$0xff]  }
  0xb6   :  { %3540 = vmatprep.mubr.msk.bf16.mxu0 %vm311_vm2, %v3915_v36 }
  0xbd   :  { %3541 = vmatmul.mubr.msk.bf16.gmra.mxu0 %vm311_vm2, %v3616_v37 }
  0xbe   :  { %3544 = vmatprep.mubr.msk.bf16.mxu0 %vm311_vm2, %v3617_v38 }
  0xc5   :  { %3545 = vmatmul.mubr.msk.bf16.gmra.mxu0 %vm311_vm2, %v3618_v39 }
  0xc6   :  { %3548 = vmatprep.mubr.msk.bf16.mxu0 %vm311_vm2, %v3620_v40 }
  0xcd   :  { %3549 = vmatmul.mubr.msk.bf16.gmra.mxu0 %vm311_vm2, %v3621_v41 }
  0xce   :  { %3552 = vmatprep.mubr.msk.bf16.mxu0 %vm311_vm2, %v3622_v42 }
  0xd5   :  { %v4045_v54 = vpop.f32.mrf.mxu0  ;;  %3553 = vmatmul.mubr.msk.bf16.gmra.mxu0 %vm311_vm2, %v3623_v43  ;;  %v4048_v55 = vpop.f32.mrf.mxu1 }
  0xd6   :  { %3556 = vmatprep.mubr.msk.bf16.mxu0 %vm311_vm2, %v3624_v44 }
  0xd7   :  { %v4051_v56 = vpop.f32.mrf.mxu0  ;;  %v4053_v57 = vpop.f32.mrf.mxu1 }
  0xd9   :  { %v4055_v58 = vpop.f32.mrf.mxu0  ;;  %v4057_v59 = vpop.f32.mrf.mxu1 }
  0xdb   :  { %v4059_v60 = vpop.f32.mrf.mxu0  ;;  %v4064_v62 = vpop.f32.mrf.mxu1 }
  0xdd   :  { %v4061_v61 = vpop.f32.mrf.mxu0  ;;  %3557 = vmatmul.mubr.msk.bf16.gmra.mxu0 %vm311_vm2, %v3625_v45  ;;  %v4071_v1 = vpop.f32.mrf.mxu1 }
  0xde   :  { %3560 = vmatprep.mubr.msk.bf16.mxu0 %vm311_vm2, %v3626_v46 }
  0xdf   :  { %v4067_v63 = vpop.f32.mrf.mxu0  ;;  %v4078_v4 = vpop.f32.mrf.mxu1 }
  0xe1   :  { %v4069_v0 = vpop.f32.mrf.mxu0  ;;  %v4085_v7 = vpop.f32.mrf.mxu1 }
  0xe3   :  { %v4073_v2 = vpop.f32.mrf.mxu0  ;;  %v4092_v10 = vpop.f32.mrf.mxu1 }
  0xe5   :  { %v4075_v3 = vpop.f32.mrf.mxu0  ;;  %3561 = vmatmul.mubr.msk.bf16.gmra.mxu0 %vm311_vm2, %v3627_v47  ;;  %v4099_v13 = vpop.f32.mrf.mxu1 }
  0xe6   :  { %3564 = vmatprep.mubr.msk.bf16.mxu0 %vm311_vm2, %v3629_v48 }
  0xe7   :  { %v4081_v5 = vpop.f32.mrf.mxu0  ;;  %v4106_v16 = vpop.f32.mrf.mxu1 }
  0xe9   :  { %v4083_v6 = vpop.f32.mrf.mxu0  ;;  %v4113_v19 = vpop.f32.mrf.mxu1 }
  0xeb   :  { %v4087_v8 = vpop.f32.mrf.mxu0  ;;  %v4124_v23 = vpop.f32.mrf.mxu1 }
  0xed   :  { %v4089_v9 = vpop.f32.mrf.mxu0  ;;  %3565 = vmatmul.mubr.msk.bf16.gmra.mxu0 %vm311_vm2, %v3630_v49  ;;  %v4136_v28 = vpop.f32.mrf.mxu1 }
  0xee   :  { %3568 = vmatprep.mubr.msk.bf16.mxu0 %vm311_vm2, %v3631_v50 }
  0xef   :  { %v4095_v11 = vpop.f32.mrf.mxu0  ;;  %v4146_v32 = vpop.f32.mrf.mxu1 }
  0xf1   :  { %v4097_v12 = vpop.f32.mrf.mxu0  ;;  %v4156_v36 = vpop.f32.mrf.mxu1 }
  0xf3   :  { %v4101_v14 = vpop.f32.mrf.mxu0  ;;  %v4163_v39 = vpop.f32.mrf.mxu1 }
  0xf5   :  { %v4103_v15 = vpop.f32.mrf.mxu0  ;;  %3569 = vmatmul.mubr.msk.bf16.gmra.mxu0 %vm311_vm2, %v3632_v51  ;;  %v4169_v42 = vpop.f32.mrf.mxu1 }
  0xf6   :  { %3572 = vmatprep.mubr.msk.bf16.mxu0 %vm311_vm2, %v3633_v52 }
  0xf7   :  { %v4109_v17 = vpop.f32.mrf.mxu0  ;;  %v4175_v45 = vpop.f32.mrf.mxu1 }
  0xf9   :  { %v4111_v18 = vpop.f32.mrf.mxu0  ;;  %v4181_v48 = vpop.f32.mrf.mxu1 }
  0xfb   :  { %v4118_v21 = vpop.f32.mrf.mxu0  ;;  %v4187_v51 = vpop.f32.mrf.mxu1 }
  0xfd   :  { %v4120_v22 = vpop.f32.mrf.mxu0  ;;  %3573 = vmatmul.mubr.msk.bf16.gmra.mxu0 %vm311_vm2, %v4012_v53 }
  0xfe   :  { %3576 = vmatprep.mubr.msk.bf16.mxu0 %vm311_vm2, %v3635_v20  ;;  %v4193_v20 = vpop.f32.mrf.mxu1 }
  0xff   :  { %v4127_v24 = vpop.f32.mrf.mxu0 }
 0x100   :  { %v4202_v25 = vpop.f32.mrf.mxu1 }
 0x101   :  { %v4131_v26 = vpop.f32.mrf.mxu0 }
 0x102   :  { %5052 = vst [vmem:[#allocation3_spill] sm:$0xff] %v4131_v26 }
 0x103   :  { %v4141_v30 = vpop.f32.mrf.mxu0 }
 0x104   :  { %5053 = vst [vmem:[#allocation4_spill] sm:$0xff] %v4141_v30  ;;  %v803_v30 = vadd.f32 %v4048_v55, %v4045_v54  ;;  %v806_v55 = vadd.f32 %v4057_v59, %v4055_v58  ;;  %v3651_v58 = vld [vmem:[%s5042_s3 + $0xe8] sm:$0xff]   ;;  %v798_v59 = vadd.f32 %v4064_v62, %v4059_v60  ;;  %v814_v62 = vadd.f32 %v4092_v10, %v4073_v2 }
 0x105   :  { %v4143_v31 = vpop.f32.mrf.mxu0  ;;  %3577 = vmatmul.mubr.msk.bf16.gmra.mxu0 %vm311_vm2, %v3636_v27 }
 0x106   :  { %3580 = vmatprep.mubr.msk.bf16.mxu0 %vm311_vm2, %v3637_v29 }
 0x107   :  { %v4149_v33 = vpop.f32.mrf.mxu0 }
 0x109   :  { %v4151_v34 = vpop.f32.mrf.mxu0 }
 0x10a   :  { %5054 = vst [vmem:[#allocation5_spill] sm:$0xff] %v4151_v34 }
 0x10b   :  { %v4158_v37 = vpop.f32.mrf.mxu0 }
 0x10c   :  { %5055 = vst [vmem:[#allocation6_spill] sm:$0xff] %v4158_v37  ;;  %v3642_v37 = vld [vmem:[%s5042_s3 + $0x80] sm:$0xff]  }
 0x10d   :  { %v4160_v38 = vpop.f32.mrf.mxu0  ;;  %3581 = vmatmul.mubr.msk.bf16.gmra.mxu0 %vm311_vm2, %v3638_v35  ;;  %v3639_v35 = vld [vmem:[%s5042_s3 + $0x98] sm:$0xff]  }
 0x10e   :  { %5056 = vst [vmem:[#allocation7_spill] sm:$0xff] %v4160_v38  ;;  %1981 = vmatpush1.bf16.msra.mxu1 %v3639_v35 }
 0x10f   :  { %v4165_v40 = vpop.f32.mrf.mxu0 }
 0x110   :  { %5057 = vst [vmem:[#allocation8_spill] sm:$0xff] %v4165_v40 }
 0x111   :  { %v4167_v41 = vpop.f32.mrf.mxu0 }
 0x112   :  { %5058 = vst [vmem:[#allocation9_spill] sm:$0xff] %v4167_v41 }
 0x113   :  { %v4171_v43 = vpop.f32.mrf.mxu0 }
 0x114   :  { %5059 = vst [vmem:[#allocation10_spill] sm:$0xff] %v4171_v43 }
 0x115   :  { %v4173_v44 = vpop.f32.mrf.mxu0 }
 0x116   :  { %5060 = vst [vmem:[#allocation11_spill] sm:$0xff] %v4173_v44  ;;  %v3640_v44 = vld [vmem:[%s5042_s3 + $0x90] sm:$0xff]  }
 0x117   :  { %v4177_v46 = vpop.f32.mrf.mxu0 }
 0x118   :  { %5061 = vst [vmem:[#allocation12_spill] sm:$0xff] %v4177_v46 }
 0x119   :  { %v4179_v47 = vpop.f32.mrf.mxu0 }
 0x11a   :  { %5062 = vst [vmem:[#allocation13_spill] sm:$0xff] %v4179_v47 }
 0x11b   :  { %v4183_v49 = vpop.f32.mrf.mxu0 }
 0x11c   :  { %5063 = vst [vmem:[#allocation14_spill] sm:$0xff] %v4183_v49 }
 0x11d   :  { %v4185_v50 = vpop.f32.mrf.mxu0 }
 0x11e   :  { %5064 = vst [vmem:[#allocation15_spill] sm:$0xff] %v4185_v50  ;;  %v5070_v50 = vmov 0  }
 0x11f   :  { %v4189_v52 = vpop.f32.mrf.mxu0  ;;  %1982 = vmatprep.subr.bf16.mxu1 %v5070_v50 }
 0x120   :  { %5065 = vst [vmem:[#allocation16_spill] sm:$0xff] %v4189_v52  ;;  %1983 = vmatpush1.bf16.msra.mxu1 %v3640_v44 }
 0x121   :  { %v4191_v53 = vpop.f32.mrf.mxu0  ;;  %1984 = vmatprep.subr.bf16.mxu1 %v5070_v50 }
 0x122   :  { %5066 = vst [vmem:[#allocation17_spill] sm:$0xff] %v4191_v53  ;;  %v4209_v53 = vpop.f32.mrf.mxu1 }
 0x123   :  { %v4195_v27 = vpop.f32.mrf.mxu0  ;;  %5072 = vst [vmem:[#allocation22_spill] sm:$0xff] %v4209_v53 }
 0x124   :  { %5067 = vst [vmem:[#allocation18_spill] sm:$0xff] %v4195_v27 }
 0x125   :  { %v4197_v29 = vpop.f32.mrf.mxu0 }
 0x126   :  { %5068 = vst [vmem:[#allocation19_spill] sm:$0xff] %v4197_v29  ;;  %v4215_v29 = vpop.f32.mrf.mxu1 }
 0x127   :  { %v4204_v49 = vpop.f32.mrf.mxu0  ;;  %5075 = vst [vmem:[#allocation25_spill] sm:$0xff] %v4215_v29 }
 0x128   :  { %5069 = vst [vmem:[#allocation20_spill] sm:$0xff] %v4204_v49  ;;  %v4224_v35 = vpop.f32.mrf.mxu1 }
 0x129   :  { %v4207_v52 = vpop.f32.mrf.mxu0 }
 0x12a   :  { %5071 = vst [vmem:[#allocation21_spill] sm:$0xff] %v4207_v52 }
 0x12b   :  { %v4211_v47 = vpop.f32.mrf.mxu0 }
 0x12c   :  { %5073 = vst [vmem:[#allocation23_spill] sm:$0xff] %v4211_v47 }
 0x12d   :  { %v4213_v27 = vpop.f32.mrf.mxu0 }
 0x12e   :  { %5074 = vst [vmem:[#allocation24_spill] sm:$0xff] %v4213_v27  ;;  %v4231_v27 = vpop.f32.mrf.mxu1 }
 0x12f   :  { %v4217_v46 = vpop.f32.mrf.mxu0 }
 0x130   :  { %5076 = vst [vmem:[#allocation26_spill] sm:$0xff] %v4217_v46  ;;  %v4237_v41 = vpop.f32.mrf.mxu1 }
 0x131   :  { %v4222_v49 = vpop.f32.mrf.mxu0  ;;  %5082 = vst [vmem:[#allocation32_spill] sm:$0xff] %v4237_v41  ;;  %v795_v41 = vadd.f32 %v4053_v57, %v4051_v56  ;;  %v835_v56 = vadd.f32 %v4099_v13, %v4075_v3  ;;  %v3650_v57 = vld [vmem:[%s5042_s3 + $0xb0] sm:$0xff]   ;;  %v811_v3 = vadd.f32 %v4078_v4, %v4067_v63  ;;  %v827_v13 = vadd.f32 %v4106_v16, %v4081_v5 }
 0x132   :  { %5077 = vst [vmem:[#allocation27_spill] sm:$0xff] %v4222_v49  ;;  %v3641_v49 = vld [vmem:[%s5042_s3 + $0x88] sm:$0xff]   ;;  %v838_v63 = vadd.f32 %v4113_v19, %v4083_v6  ;;  %v830_v16 = vadd.f32 %v4124_v23, %v4087_v8  ;;  %v3653_v8 = vld [vmem:[%s5042_s3 + $0xe0] sm:$0xff]   ;;  %v851_v23 = vadd.f32 %v4136_v28, %v4089_v9 }
 0x133   :  { %v4226_v52 = vpop.f32.mrf.mxu0  ;;  %1985 = vmatpush1.bf16.msra.mxu1 %v3641_v49 }
 0x134   :  { %5078 = vst [vmem:[#allocation28_spill] sm:$0xff] %v4226_v52  ;;  %1986 = vmatprep.subr.bf16.mxu1 %v5070_v50 }
 0x135   :  { %v4229_v47 = vpop.f32.mrf.mxu0 }
 0x136   :  { %5079 = vst [vmem:[#allocation29_spill] sm:$0xff] %v4229_v47  ;;  %v4247_v47 = vpop.f32.mrf.mxu1 }
 0x137   :  { %v4233_v43 = vpop.f32.mrf.mxu0  ;;  %5085 = vst [vmem:[#allocation35_spill] sm:$0xff] %v4247_v47  ;;  %1987 = vmatpush1.bf16.msra.mxu1 %v3642_v37  ;;  %v3643_v37 = vld [vmem:[%s5042_s3 + $0x78] sm:$0xff]  }
 0x138   :  { %5080 = vst [vmem:[#allocation30_spill] sm:$0xff] %v4233_v43  ;;  %1988 = vmatprep.subr.bf16.mxu1 %v5070_v50 }
 0x139   :  { %v4235_v46 = vpop.f32.mrf.mxu0 }
 0x13a   :  { %5081 = vst [vmem:[#allocation31_spill] sm:$0xff] %v4235_v46  ;;  %v4253_v46 = vpop.f32.mrf.mxu1 }
 0x13b   :  { %v4242_v40 = vpop.f32.mrf.mxu0  ;;  %5088 = vst [vmem:[#allocation38_spill] sm:$0xff] %v4253_v46  ;;  %1989 = vmatpush1.bf16.msra.mxu1 %v3643_v37  ;;  %v3645_v37 = vld [vmem:[%s5042_s3 + $0x68] sm:$0xff]  }
 0x13c   :  { %5083 = vst [vmem:[#allocation33_spill] sm:$0xff] %v4242_v40  ;;  %v4262_v49 = vpop.f32.mrf.mxu1  ;;  %1990 = vmatprep.subr.bf16.mxu1 %v5070_v50 }
 0x13d   :  { %v4244_v44 = vpop.f32.mrf.mxu0  ;;  %5091 = vst [vmem:[#allocation41_spill] sm:$0xff] %v4262_v49  ;;  %v3647_v49 = vld [vmem:[%s5042_s3 + $0xf8] sm:$0xff]  }
 0x13e   :  { %5084 = vst [vmem:[#allocation34_spill] sm:$0xff] %v4244_v44  ;;  %2350 = vmatpush1.bf16.msra.mxu0 %v3647_v49  ;;  %v4328_v49 = vld [vmem:[%s5043_s2] ss:$0 sm:$0xff] }
 0x13f   :  { %v4249_v52 = vpop.f32.mrf.mxu0  ;;  %2351 = vmatprep.subr.bf16.mxu0 %v5070_v50 }
 0x140   :  { %5086 = vst [vmem:[#allocation36_spill] sm:$0xff] %v4249_v52 }
 0x141   :  { %v4251_v43 = vpop.f32.mrf.mxu0 }
 0x142   :  { %5087 = vst [vmem:[#allocation37_spill] sm:$0xff] %v4251_v43  ;;  %v4269_v43 = vpop.f32.mrf.mxu1 }
 0x143   :  { %v4255_v38 = vpop.f32.mrf.mxu0  ;;  %5094 = vst [vmem:[#allocation44_spill] sm:$0xff] %v4269_v43 }
 0x144   :  { %5089 = vst [vmem:[#allocation39_spill] sm:$0xff] %v4255_v38  ;;  %v4275_v47 = vpop.f32.mrf.mxu1 }
 0x145   :  { %v4260_v40 = vpop.f32.mrf.mxu0  ;;  %5097 = vst [vmem:[#allocation47_spill] sm:$0xff] %v4275_v47 }
 0x146   :  { %5090 = vst [vmem:[#allocation40_spill] sm:$0xff] %v4260_v40 }
 0x147   :  { %v4264_v44 = vpop.f32.mrf.mxu0 }
 0x148   :  { %5092 = vst [vmem:[#allocation42_spill] sm:$0xff] %v4264_v44  ;;  %v4284_v44 = vpop.f32.mrf.mxu1 }
 0x149   :  { %v4267_v52 = vpop.f32.mrf.mxu0  ;;  %5100 = vst [vmem:[#allocation50_spill] sm:$0xff] %v4284_v44 }
 0x14a   :  { %5093 = vst [vmem:[#allocation43_spill] sm:$0xff] %v4267_v52  ;;  %v4289_v43 = vpop.f32.mrf.mxu1 }
 0x14b   :  { %v4271_v46 = vpop.f32.mrf.mxu0  ;;  %5102 = vst [vmem:[#allocation52_spill] sm:$0xff] %v4289_v43 }
 0x14c   :  { %5095 = vst [vmem:[#allocation45_spill] sm:$0xff] %v4271_v46 }
 0x14d   :  { %v4273_v38 = vpop.f32.mrf.mxu0 }
 0x14e   :  { %5096 = vst [vmem:[#allocation46_spill] sm:$0xff] %v4273_v38 }
 0x14f   :  { %v4277_v29 = vpop.f32.mrf.mxu0 }
 0x150   :  { %5098 = vst [vmem:[#allocation48_spill] sm:$0xff] %v4277_v29  ;;  %v3644_v29 = vld [vmem:[%s5042_s3 + $0x70] sm:$0xff]  }
 0x151   :  { %v4282_v40 = vpop.f32.mrf.mxu0  ;;  %1991 = vmatpush1.bf16.msra.mxu1 %v3644_v29  ;;  %v3646_v29 = vld [vmem:[%s5042_s3 + $0x60] sm:$0xff]  }
 0x152   :  { %5099 = vst [vmem:[#allocation49_spill] sm:$0xff] %v4282_v40  ;;  %1992 = vmatprep.subr.bf16.mxu1 %v5070_v50  ;;  %v4295_v40 = vpop.f32.mrf.mxu1 }
 0x153   :  { %v4286_v52 = vpop.f32.mrf.mxu0  ;;  %5103 = vst [vmem:[#allocation53_spill] sm:$0xff] %v4295_v40 }
 0x154   :  { %5101 = vst [vmem:[#allocation51_spill] sm:$0xff] %v4286_v52  ;;  %v4301_v43 = vpop.f32.mrf.mxu1 }
 0x155   :  { %v3522_v46 = vpop.f32.mrf.mxu0  ;;  %1993 = vmatpush1.bf16.msra.mxu1 %v3645_v37  ;;  %5104 = vst [vmem:[#allocation54_spill] sm:$0xff] %v4301_v43  ;;  %v3648_v37 = vld [vmem:[%s5042_s3 + $0xb8] sm:$0xff]   ;;  %v3649_v43 = vld [vmem:[%s5042_s3 + $0xf0] sm:$0xff]  }
 0x156   :  { %1994 = vmatprep.subr.bf16.mxu1 %v5070_v50  ;;  %v4321_v53 = vpop.f32.mrf.mxu1  ;;  %v1404_v54 = vadd.f32 %v3522_v46, %v803_v30  ;;  %2352 = vmatpush1.bf16.msra.mxu0 %v3649_v43  ;;  %v819_v30 = vadd.f32 %v4071_v1, %v4061_v61  ;;  %v822_v61 = vadd.f32 %v4085_v7, %v4069_v0 }
 0x157   :  { %v1147_v38 = vpop.f32.mrf.mxu0  ;;  %2353 = vmatprep.subr.bf16.mxu0 %v5070_v50 }
 0x158   :  { %v4350_v43 = vpop.f32.mrf.mxu1  ;;  %v1475_v46 = vadd.f32 %v4328_v49, %v1404_v54 }
 0x159   :  { %v3523_v47 = vpop.f32.mrf.mxu0  ;;  %1995 = vmatpush1.bf16.msra.mxu1 %v3646_v29  ;;  %v1402_v29 = vadd.f32 %v1147_v38, %v795_v41 }
 0x15a   :  { %2004 = vmatprep.subr.bf16.mxu1 %v5070_v50  ;;  %v1405_v38 = vadd.f32 %v3523_v47, %v806_v55  ;;  %2354 = vmatpush1.bf16.msra.mxu0 %v3651_v58  ;;  %v4366_v2 = vpop.f32.mrf.mxu1  ;;  %v1539_v10 = vmax.f32 %v1475_v46, 0.0  ;;  %v3652_v55 = vld [vmem:[%s5042_s3 + $0xa8] sm:$0xff]  }
 0x15b   :  { %v1150_v52 = vpop.f32.mrf.mxu0  ;;  %v1473_v1 = vadd.f32 %v4328_v49, %v1402_v29  ;;  %2355 = vmatprep.subr.bf16.mxu0 %v5070_v50 }
 0x15c   :  { %v1403_v47 = vadd.f32 %v1150_v52, %v798_v59  ;;  %v1476_v0 = vadd.f32 %v4328_v49, %v1405_v38  ;;  %v4384_v28 = vpop.f32.mrf.mxu1 }
 0x15d   :  { %v3526_v44 = vpop.f32.mrf.mxu0  ;;  %2005 = vmatpush2.bf16.msra.mxu1 %v3648_v37 }
 0x15e   :  { %2006 = vmatprep.subr.bf16.mxu1 %v5070_v50  ;;  %v1408_v7 = vadd.f32 %v3526_v44, %v819_v30  ;;  %v1537_v44 = vmax.f32 %v1473_v1, 0.0  ;;  %v1474_v29 = vadd.f32 %v4328_v49, %v1403_v47  ;;  %2356 = vmatpush1.bf16.msra.mxu0 %v3653_v8 }
 0x15f   :  { %v1163_v40 = vpop.f32.mrf.mxu0  ;;  %2357 = vmatprep.subr.bf16.mxu0 %v5070_v50 }
 0x160   :  { %v1479_v46 = vadd.f32 %v4328_v49, %v1408_v7 }
 0x161   :  { %v3527_v34 = vpop.f32.mrf.mxu0  ;;  %2007 = vmatpush2.bf16.msra.mxu1 %v3650_v57 }
 0x162   :  { %2008 = vmatprep.subr.bf16.mxu1 %v5070_v50 }
 0x163   :  { %v4330_v26 = vpop.f32.mrf.mxu0 }
 0x165   :  { %v3530_v41 = vpop.f32.mrf.mxu0  ;;  %2009 = vmatpush2.bf16.msra.mxu1 %v3652_v55  ;;  %v3656_v55 = vld [vmem:[%s5042_s3 + $0xd0] sm:$0xff]  }
 0x166   :  { %v1412_v60 = vadd.f32 %v3530_v41, %v835_v56  ;;  %v1406_v56 = vadd.f32 %v1163_v40, %v811_v3  ;;  %v843_v41 = vadd.f32 %v4146_v32, %v4095_v11  ;;  %2010 = vmatprep.subr.bf16.mxu1 %v5070_v50  ;;  %v3654_v11 = vld [vmem:[%s5042_s3 + $0xa0] sm:$0xff]   ;;  %v3655_v32 = vld [vmem:[%s5042_s3 + $0xd8] sm:$0xff]  }
 0x167   :  { %v1179_v37 = vpop.f32.mrf.mxu0  ;;  %2358 = vmatpush1.bf16.msra.mxu0 %v3655_v32 }
 0x168   :  { %v1483_v4 = vadd.f32 %v4328_v49, %v1412_v60  ;;  %v1410_v5 = vadd.f32 %v1179_v37, %v827_v13  ;;  %v1540_v13 = vmax.f32 %v1476_v0, 0.0  ;;  %v1409_v60 = vadd.f32 %v3527_v34, %v822_v61  ;;  %2359 = vmatprep.subr.bf16.mxu0 %v5070_v50 }
 0x169   :  { %v3531_v54 = vpop.f32.mrf.mxu0  ;;  %v854_v34 = vadd.f32 %v4156_v36, %v4097_v12  ;;  %v1538_v61 = vmax.f32 %v1474_v29, 0.0  ;;  %v1477_v37 = vadd.f32 %v4328_v49, %v1406_v56  ;;  %2011 = vmatpush2.bf16.msra.mxu1 %v3654_v11 }
 0x16a   :  { %v1547_v6 = vmax.f32 %v1483_v4, 0.0  ;;  %v1481_v19 = vadd.f32 %v4328_v49, %v1410_v5  ;;  %v1413_v52 = vadd.f32 %v3531_v54, %v838_v63  ;;  %v1407_v63 = vadd.f32 %v4330_v26, %v814_v62  ;;  %2155 = vmatprep.subr.bf16.mxu1 %v5070_v50  ;;  %v4403_v26 = vpop.f32.mrf.mxu1 }
 0x16b   :  { %v1182_v57 = vpop.f32.mrf.mxu0  ;;  %v846_v54 = vadd.f32 %v4163_v39, %v4101_v14  ;;  %v1541_v14 = vmax.f32 %v1477_v37, 0.0  ;;  %2360 = vmatpush1.bf16.msra.mxu0 %v3656_v55 }
 0x16c   :  { %v1603_v58 = vmax.f32 %v1539_v10, %v1547_v6  ;;  %v1545_v59 = vmax.f32 %v1481_v19, 0.0  ;;  %v1484_v30 = vadd.f32 %v4328_v49, %v1413_v52  ;;  %v1411_v38 = vadd.f32 %v1182_v57, %v830_v16  ;;  %2361 = vmatprep.subr.bf16.mxu0 %v5070_v50 }
 0x16d   :  { %v3534_v9 = vpop.f32.mrf.mxu0  ;;  %v1543_v10 = vmax.f32 %v1479_v46, 0.0  ;;  %v1480_v6 = vadd.f32 %v4328_v49, %v1409_v60  ;;  %v1478_v39 = vadd.f32 %v4328_v49, %v1407_v63 }
 0x16e   :  { %v1548_v40 = vmax.f32 %v1484_v30, 0.0  ;;  %v1482_v3 = vadd.f32 %v4328_v49, %v1411_v38  ;;  %v1416_v1 = vadd.f32 %v3534_v9, %v851_v23  ;;  %v1601_v47 = vmax.f32 %v1537_v44, %v1545_v59  ;;  %v4412_v38 = vpop.f32.mrf.mxu1 }
 0x16f   :  { %v1195_v4 = vpop.f32.mrf.mxu0 }
 0x170   :  { %v1604_v5 = vmax.f32 %v1540_v13, %v1548_v40  ;;  %v1546_v16 = vmax.f32 %v1482_v3, 0.0  ;;  %v1487_v0 = vadd.f32 %v4328_v49, %v1416_v1  ;;  %v1414_v7 = vadd.f32 %v1195_v4, %v843_v41  ;;  %v4423_v32 = vpop.f32.mrf.mxu1 }
 0x171   :  { %v3535_v12 = vpop.f32.mrf.mxu0  ;;  %v1544_v41 = vmax.f32 %v1480_v6, 0.0  ;;  %v1542_v3 = vmax.f32 %v1478_v39, 0.0 }
 0x172   :  { %v1551_v36 = vmax.f32 %v1487_v0, 0.0  ;;  %v1485_v62 = vadd.f32 %v4328_v49, %v1414_v7  ;;  %v1417_v19 = vadd.f32 %v3535_v12, %v854_v34  ;;  %v1602_v52 = vmax.f32 %v1538_v61, %v1546_v16  ;;  %v3658_v61 = vld [vmem:[%s5042_s3 + $0xc0] sm:$0xff]   ;;  %v3659_v16 = vld [vmem:[%s5042_s3 + $0x118] sm:$0xff]   ;;  %v4436_v7 = vpop.f32.mrf.mxu1 }
 0x173   :  { %v1198_v8 = vpop.f32.mrf.mxu0  ;;  %v1634_v23 = vmax.f32 %v1603_v58, %v1604_v5  ;;  %v3657_v58 = vld [vmem:[%s5042_s3 + $0xc8] sm:$0xff]   ;;  %v867_v12 = vadd.f32 %v4169_v42, %v4103_v15  ;;  %v870_v42 = vadd.f32 %v4181_v48, %v4111_v18  ;;  %v891_v48 = vadd.f32 %v4231_v27, %v4149_v33 }
 0x174   :  { %v1607_v44 = vmax.f32 %v1543_v10, %v1551_v36  ;;  %v1549_v29 = vmax.f32 %v1485_v62, 0.0  ;;  %v1488_v56 = vadd.f32 %v4328_v49, %v1417_v19  ;;  %v1415_v57 = vadd.f32 %v1198_v8, %v846_v54  ;;  %2362 = vmatpush1.bf16.msra.mxu0 %v3657_v58  ;;  %v3660_v36 = vld [vmem:[%s5042_s3 + $0x110] sm:$0xff]  }
 0x175   :  { %v3538_v59 = vpop.f32.mrf.mxu0  ;;  %v1633_v30 = vmax.f32 %v1601_v47, %v1602_v52  ;;  %2363 = vmatprep.subr.bf16.mxu0 %v5070_v50  ;;  %v4428_v63 = vpack.c.bf16 %v1634_v23, %v1634_v23  ;;  %v859_v62 = vadd.f32 %v4175_v45, %v4109_v17  ;;  %v4454_v52 = vpop.f32.mrf.mxu1  ;;  %v899_v8 = vadd.f32 %v4224_v35, %v4143_v31  ;;  %v3661_v17 = vld [vmem:[%s5042_s3 + $0x108] sm:$0xff]  }
 0x176   :  { %v1605_v13 = vmax.f32 %v1541_v14, %v1549_v29  ;;  %v1552_v46 = vmax.f32 %v1488_v56, 0.0  ;;  %v1486_v60 = vadd.f32 %v4328_v49, %v1415_v57  ;;  %v1420_v15 = vadd.f32 %v3538_v59, %v867_v12  ;;  %v5105_v59 = vld [vmem:[#allocation3_spill] sm:$0xff]  ;;  %v5108_v33 = vld [vmem:[#allocation32_spill] sm:$0xff]  ;;  %v5114_v12 = vld [vmem:[#allocation38_spill] sm:$0xff] }
 0x177   :  { %v1211_v9 = vpop.f32.mrf.mxu0  ;;  %v4418_v40 = vpack.c.bf16 %v1633_v30, %v1633_v30  ;;  %v862_v45 = vadd.f32 %v4187_v51, %v4118_v21  ;;  %v883_v29 = vadd.f32 %v4193_v20, %v4120_v22  ;;  %v875_v21 = vadd.f32 %v4202_v25, %v4127_v24  ;;  %v5106_v30 = vld [vmem:[#allocation22_spill] sm:$0xff]  ;;  %v5109_v58 = vld [vmem:[#allocation4_spill] sm:$0xff] }
 0x178   :  { %v1608_v1 = vmax.f32 %v1544_v41, %v1552_v46  ;;  %v1550_v11 = vmax.f32 %v1486_v60, 0.0  ;;  %2364 = vmatpush1.bf16.msra.mxu0 %v3658_v61  ;;  %v1418_v55 = vadd.f32 %v1211_v9, %v859_v62  ;;  %v1491_v31 = vadd.f32 %v4328_v49, %v1420_v15  ;;  %v5110_v9 = vld [vmem:[#allocation25_spill] sm:$0xff]  ;;  %v5111_v20 = vld [vmem:[#allocation6_spill] sm:$0xff] }
 0x179   :  { %1684 = vrot.lane.b32.xlu0 %v4418_v40, %s3711_s1  ;;  %v3539_v47 = vpop.f32.mrf.mxu0  ;;  %2373 = vmatprep.subr.bf16.mxu0 %v5070_v50  ;;  %v886_v41 = vadd.f32 %v5106_v30, %v5105_v59  ;;  %v878_v22 = vadd.f32 %v5110_v9, %v5109_v58  ;;  %v5117_v30 = vld [vmem:[#allocation9_spill] sm:$0xff] }
 0x17a   :  { %v1606_v34 = vmax.f32 %v1542_v3, %v1550_v11  ;;  %v1636_v4 = vmax.f32 %v1607_v44, %v1608_v1  ;;  %v4472_v44 = vpop.f32.mrf.mxu1  ;;  %v1489_v51 = vadd.f32 %v4328_v49, %v1418_v55  ;;  %v5112_v3 = vld [vmem:[#allocation35_spill] sm:$0xff] }
 0x17b   :  { %v1214_v37 = vpop.f32.mrf.mxu0  ;;  %v894_v24 = vadd.f32 %v5112_v3, %v5111_v20  ;;  %v5119_v3 = vld [vmem:[#allocation10_spill] sm:$0xff] }
 0x17c   :  { %v1635_v5 = vmax.f32 %v1605_v13, %v1606_v34  ;;  %2374 = vmatpush2.bf16.msra.mxu0 %v3659_v16  ;;  %v4458_v39 = vpack.c.bf16 %v1636_v4, %v1636_v4  ;;  %v1419_v56 = vadd.f32 %v1214_v37, %v862_v45  ;;  %v5107_v13 = vld [vmem:[#allocation5_spill] sm:$0xff]  ;;  %v1555_v34 = vmax.f32 %v1491_v31, 0.0  ;;  %v5113_v16 = vld [vmem:[#allocation7_spill] sm:$0xff] }
 0x17d   :  { %1686 = vrot.lane.b32.xlu0 %v4428_v63, %s3711_s1  ;;  %v3542_v0 = vpop.f32.mrf.mxu0  ;;  %2375 = vmatprep.subr.bf16.mxu0 %v5070_v50  ;;  %v902_v27 = vadd.f32 %v5108_v33, %v5107_v13  ;;  %v1553_v62 = vmax.f32 %v1489_v51, 0.0  ;;  %v5118_v13 = vld [vmem:[#allocation44_spill] sm:$0xff] }
 0x17e   :  { %v4438_v54 = vpack.c.bf16 %v1635_v5, %v1634_v23  ;;  %v4440_v6 = vpack.c.bf16 %v1635_v5, %v1635_v5  ;;  %v1421_v23 = vadd.f32 %v3539_v47, %v870_v42  ;;  %v1424_v1 = vadd.f32 %v3542_v0, %v883_v29  ;;  %v4491_v47 = vpop.f32.mrf.mxu1  ;;  %v3662_v5 = vld [vmem:[%s5042_s3 + $0x100] sm:$0xff]  }
 0x17f   :  { %v1227_v10 = vpop.f32.mrf.mxu0  ;;  %v1490_v0 = vadd.f32 %v4328_v49, %v1419_v56  ;;  %v918_v33 = vadd.f32 %v5118_v13, %v5117_v30 }
 0x180   :  { %3102 = vmatprep.mubr.msk.bf16.mxu1 %vm1716_vm3, %v4438_v54  ;;  %1688 = vrot.lane.b32.xlu1 %v4440_v6, %s3711_s1  ;;  %v1492_v25 = vadd.f32 %v4328_v49, %v1421_v23  ;;  %v1422_v15 = vadd.f32 %v1227_v10, %v875_v21  ;;  %v5115_v23 = vld [vmem:[#allocation8_spill] sm:$0xff]  ;;  %v4504_v59 = vpop.f32.mrf.mxu1 }
 0x181   :  { %v3543_v19 = vpop.f32.mrf.mxu0  ;;  %2376 = vmatpush2.bf16.msra.mxu0 %v3660_v36  ;;  %v915_v36 = vadd.f32 %v5114_v12, %v5113_v16 }
 0x182   :  { %2377 = vmatprep.subr.bf16.mxu0 %v5070_v50  ;;  %v1556_v31 = vmax.f32 %v1492_v25, 0.0  ;;  %v1425_v29 = vadd.f32 %v3543_v19, %v886_v41 }
 0x183   :  { %v1230_v14 = vpop.f32.mrf.mxu0 }
 0x184   :  { %1690 = vrot.lane.b32.xlu1 %v4458_v39, %s3711_s1 }
 0x185   :  { %v3546_v18 = vpop.f32.mrf.mxu0  ;;  %2378 = vmatpush2.bf16.msra.mxu0 %v3661_v17 }
 0x186   :  { %v1428_v35 = vadd.f32 %v3546_v18, %v899_v8  ;;  %2379 = vmatprep.subr.bf16.mxu0 %v5070_v50  ;;  %v5116_v18 = vld [vmem:[#allocation41_spill] sm:$0xff] }
 0x187   :  { %v1243_v57 = vpop.f32.mrf.mxu0 }
 0x188   :  { %v1499_v46 = vadd.f32 %v4328_v49, %v1428_v35  ;;  %v1426_v60 = vadd.f32 %v1243_v57, %v891_v48  ;;  %v907_v48 = vadd.f32 %v5116_v18, %v5115_v23  ;;  %v1495_v35 = vadd.f32 %v4328_v49, %v1424_v1 }
 0x189   :  { %v3547_v11 = vpop.f32.mrf.mxu0  ;;  %2380 = vmatpush2.bf16.msra.mxu0 %v3662_v5 }
 0x18a   :  { %v1563_v61 = vmax.f32 %v1499_v46, 0.0  ;;  %v1497_v37 = vadd.f32 %v4328_v49, %v1426_v60  ;;  %v1429_v4 = vadd.f32 %v3547_v11, %v902_v27  ;;  %v1554_v27 = vmax.f32 %v1490_v0, 0.0 }
 0x18b   :  { %v1246_v42 = vpop.f32.mrf.mxu0  ;;  %v1493_v46 = vadd.f32 %v4328_v49, %v1422_v15  ;;  %v1423_v60 = vadd.f32 %v1230_v14, %v878_v22  ;;  %v1559_v1 = vmax.f32 %v1495_v35, 0.0  ;;  %v1496_v11 = vadd.f32 %v4328_v49, %v1425_v29 }
 0x18c   :  { %v1611_v55 = vmax.f32 %v1555_v34, %v1563_v61  ;;  %v1561_v8 = vmax.f32 %v1497_v37, 0.0  ;;  %v1500_v17 = vadd.f32 %v4328_v49, %v1429_v4  ;;  %v1427_v45 = vadd.f32 %v1246_v42, %v894_v24  ;;  %v5120_v24 = vld [vmem:[#allocation47_spill] sm:$0xff]  ;;  %v4514_v61 = vpop.f32.mrf.mxu1 }
 0x18d   :  { %v3550_v57 = vpop.f32.mrf.mxu0  ;;  %v910_v25 = vadd.f32 %v5120_v24, %v5119_v3  ;;  %v1557_v22 = vmax.f32 %v1493_v46, 0.0  ;;  %v1494_v16 = vadd.f32 %v4328_v49, %v1423_v60  ;;  %v1560_v18 = vmax.f32 %v1496_v11, 0.0  ;;  %v5122_v3 = vld [vmem:[#allocation50_spill] sm:$0xff] }
 0x18e   :  { %v1609_v51 = vmax.f32 %v1553_v62, %v1561_v8  ;;  %v1564_v56 = vmax.f32 %v1500_v17, 0.0  ;;  %v1498_v10 = vadd.f32 %v4328_v49, %v1427_v45  ;;  %v1432_v21 = vadd.f32 %v3550_v57, %v915_v36  ;;  %v4521_v23 = vpop.f32.mrf.mxu1 }
 0x18f   :  { %v1259_v58 = vpop.f32.mrf.mxu0  ;;  %v1558_v57 = vmax.f32 %v1494_v16, 0.0 }
 0x190   :  { %v1612_v9 = vmax.f32 %v1556_v31, %v1564_v56  ;;  %v1562_v20 = vmax.f32 %v1498_v10, 0.0  ;;  %v1503_v19 = vadd.f32 %v4328_v49, %v1432_v21  ;;  %v1430_v41 = vadd.f32 %v1259_v58, %v907_v48  ;;  %v4530_v21 = vpop.f32.mrf.mxu1 }
 0x191   :  { %v3551_v34 = vpop.f32.mrf.mxu0 }
 0x192   :  { %v1610_v37 = vmax.f32 %v1554_v27, %v1562_v20  ;;  %v1567_v4 = vmax.f32 %v1503_v19, 0.0  ;;  %v1501_v5 = vadd.f32 %v4328_v49, %v1430_v41  ;;  %v1433_v14 = vadd.f32 %v3551_v34, %v918_v33  ;;  %v4534_v58 = vpop.f32.mrf.mxu1  ;;  %v5121_v41 = vld [vmem:[#allocation11_spill] sm:$0xff] }
 0x193   :  { %v1262_v12 = vpop.f32.mrf.mxu0  ;;  %v1638_v36 = vmax.f32 %v1611_v55, %v1612_v9  ;;  %v931_v24 = vadd.f32 %v5122_v3, %v5121_v41  ;;  %v5134_v3 = vld [vmem:[#allocation21_spill] sm:$0xff] }
 0x194   :  { %v1615_v62 = vmax.f32 %v1559_v1, %v1567_v4  ;;  %v1565_v0 = vmax.f32 %v1501_v5, 0.0  ;;  %v1504_v15 = vadd.f32 %v4328_v49, %v1433_v14  ;;  %v1431_v42 = vadd.f32 %v1262_v12, %v910_v25  ;;  %v5123_v25 = vld [vmem:[#allocation12_spill] sm:$0xff]  ;;  %v5125_v5 = vld [vmem:[#allocation13_spill] sm:$0xff] }
 0x195   :  { %v3554_v8 = vpop.f32.mrf.mxu0  ;;  %v4519_v17 = vpack.c.bf16 %v1638_v36, %v1638_v36  ;;  %v1637_v45 = vmax.f32 %v1609_v51, %v1610_v37  ;;  %v5124_v1 = vld [vmem:[#allocation52_spill] sm:$0xff]  ;;  %v4550_v37 = vpop.f32.mrf.mxu1  ;;  %v5126_v14 = vld [vmem:[#allocation53_spill] sm:$0xff] }
 0x196   :  { %v1613_v48 = vmax.f32 %v1557_v22, %v1565_v0  ;;  %v1568_v31 = vmax.f32 %v1504_v15, 0.0  ;;  %v1502_v35 = vadd.f32 %v4328_v49, %v1431_v42  ;;  %v923_v11 = vadd.f32 %v5124_v1, %v5123_v25  ;;  %v5128_v0 = vld [vmem:[#allocation14_spill] sm:$0xff] }
 0x197   :  { %1694 = vrot.lane.b32.xlu1 %v4519_v17, %s3711_s1  ;;  %v1275_v55 = vpop.f32.mrf.mxu0  ;;  %v4526_v29 = vpack.c.bf16 %v1637_v45, %v1637_v45  ;;  %v1436_v4 = vadd.f32 %v3554_v8, %v931_v24  ;;  %v934_v22 = vadd.f32 %v5126_v14, %v5125_v5  ;;  %v5129_v15 = vld [vmem:[#allocation54_spill] sm:$0xff] }
 0x198   :  { %v1616_v56 = vmax.f32 %v1560_v18, %v1568_v31  ;;  %v1566_v10 = vmax.f32 %v1502_v35, 0.0  ;;  %v1434_v16 = vadd.f32 %v1275_v55, %v923_v11  ;;  %v926_v42 = vadd.f32 %v5129_v15, %v5128_v0  ;;  %v4560_v35 = vpop.f32.mrf.mxu1  ;;  %v5135_v1 = vld [vmem:[#allocation18_spill] sm:$0xff] }
 0x199   :  { %1692 = vrot.lane.b32.xlu0 %v4526_v29, %s3711_s1  ;;  %v3555_v51 = vpop.f32.mrf.mxu0  ;;  %v1507_v8 = vadd.f32 %v4328_v49, %v1436_v4  ;;  %v942_v11 = vadd.f32 %v4384_v28, %v5135_v1  ;;  %v5140_v1 = vld [vmem:[#allocation28_spill] sm:$0xff] }
 0x19a   :  { %v1614_v30 = vmax.f32 %v1558_v57, %v1566_v10  ;;  %v1640_v33 = vmax.f32 %v1615_v62, %v1616_v56  ;;  %v1437_v45 = vadd.f32 %v3555_v51, %v934_v22  ;;  %v5131_v56 = vld [vmem:[#allocation15_spill] sm:$0xff]  ;;  %v5132_v10 = vld [vmem:[#allocation16_spill] sm:$0xff]  ;;  %v5133_v51 = vld [vmem:[#allocation17_spill] sm:$0xff]  ;;  %v4578_v14 = vpop.f32.mrf.mxu1 }
 0x19b   :  { %v1278_v13 = vpop.f32.mrf.mxu0  ;;  %v947_v55 = vadd.f32 %v4321_v53, %v5131_v56  ;;  %v950_v41 = vadd.f32 %v4366_v2, %v5133_v51  ;;  %v5136_v53 = vld [vmem:[#allocation23_spill] sm:$0xff]  ;;  %v1571_v22 = vmax.f32 %v1507_v8, 0.0 }
 0x19c   :  { %v1639_v27 = vmax.f32 %v1613_v48, %v1614_v30  ;;  %v4532_v60 = vpack.c.bf16 %v1640_v33, %v1640_v33  ;;  %v5130_v48 = vld [vmem:[#allocation20_spill] sm:$0xff]  ;;  %v939_v30 = vadd.f32 %v4350_v43, %v5132_v10  ;;  %v1435_v33 = vadd.f32 %v1278_v13, %v926_v42  ;;  %v4588_v10 = vpop.f32.mrf.mxu1 }
 0x19d   :  { %v3558_v46 = vpop.f32.mrf.mxu0  ;;  %v955_v31 = vadd.f32 %v4412_v38, %v5130_v48  ;;  %v966_v38 = vadd.f32 %v4423_v32, %v5134_v3  ;;  %v958_v4 = vadd.f32 %v4436_v7, %v5136_v53  ;;  %v1508_v43 = vadd.f32 %v4328_v49, %v1437_v45  ;;  %v5138_v48 = vld [vmem:[#allocation26_spill] sm:$0xff] }
 0x19e   :  { %v4536_v9 = vpack.c.bf16 %v1639_v27, %v1638_v36  ;;  %1698 = vrot.lane.b32.xlu1 %v4532_v60, %s3711_s1  ;;  %v4540_v19 = vpack.c.bf16 %v1639_v27, %v1639_v27  ;;  %v5127_v36 = vld [vmem:[#allocation19_spill] sm:$0xff]  ;;  %v1440_v5 = vadd.f32 %v3558_v46, %v947_v55  ;;  %v1506_v28 = vadd.f32 %v4328_v49, %v1435_v33 }
 0x19f   :  { %v1291_v20 = vpop.f32.mrf.mxu0  ;;  %v963_v62 = vadd.f32 %v4403_v26, %v5127_v36  ;;  %v1505_v26 = vadd.f32 %v4328_v49, %v1434_v16  ;;  %v5137_v36 = vld [vmem:[#allocation24_spill] sm:$0xff]  ;;  %v1572_v8 = vmax.f32 %v1508_v43, 0.0  ;;  %v5139_v33 = vld [vmem:[#allocation27_spill] sm:$0xff]  ;;  %v974_v53 = vadd.f32 %v4504_v59, %v5140_v1 }
 0x1a0   :  { %3168 = vmatprep.mubr.msk.bf16.mxu0 %vm1716_vm3, %v4536_v9  ;;  %1696 = vrot.lane.b32.xlu0 %v4540_v19, %s3711_s1  ;;  %v1438_v15 = vadd.f32 %v1291_v20, %v939_v30  ;;  %v1570_v51 = vmax.f32 %v1506_v28, 0.0 }
 0x1a1   :  { %v3559_v34 = vpop.f32.mrf.mxu0  ;;  %v1569_v0 = vmax.f32 %v1505_v26, 0.0 }
 0x1a2   :  { %v1441_v56 = vadd.f32 %v3559_v34, %v950_v41  ;;  %v1509_v3 = vadd.f32 %v4328_v49, %v1438_v15 }
 0x1a3   :  { %v1294_v12 = vpop.f32.mrf.mxu0 }
 0x1a4   :  { %v1512_v43 = vadd.f32 %v4328_v49, %v1441_v56 }
 0x1a5   :  { %v3562_v18 = vpop.f32.mrf.mxu0 }
 0x1a6   :  { %v1444_v57 = vadd.f32 %v3562_v18, %v963_v62  ;;  %v979_v62 = vadd.f32 %v4454_v52, %v5137_v36 }
 0x1a7   :  { %v1307_v27 = vpop.f32.mrf.mxu0 }
 0x1a8   :  { %v1515_v24 = vadd.f32 %v4328_v49, %v1444_v57  ;;  %v1442_v25 = vadd.f32 %v1307_v27, %v955_v31  ;;  %v971_v31 = vadd.f32 %v4472_v44, %v5138_v48  ;;  %v1511_v57 = vadd.f32 %v4328_v49, %v1440_v5 }
 0x1a9   :  { %v3563_v13 = vpop.f32.mrf.mxu0  ;;  %v982_v27 = vadd.f32 %v4491_v47, %v5139_v33 }
 0x1aa   :  { %v1579_v2 = vmax.f32 %v1515_v24, 0.0  ;;  %v1513_v16 = vadd.f32 %v4328_v49, %v1442_v25  ;;  %v1445_v32 = vadd.f32 %v3563_v13, %v966_v38  ;;  %v1439_v38 = vadd.f32 %v1294_v12, %v942_v11  ;;  %v3506_v13 = vpop.f32.mrf.mxu1 }
 0x1ab   :  { %v1310_v42 = vpop.f32.mrf.mxu0  ;;  %v1573_v12 = vmax.f32 %v1509_v3, 0.0 }
 0x1ac   :  { %v1619_v7 = vmax.f32 %v1571_v22, %v1579_v2  ;;  %v1577_v18 = vmax.f32 %v1513_v16, 0.0  ;;  %v1516_v46 = vadd.f32 %v4328_v49, %v1445_v32  ;;  %v1443_v45 = vadd.f32 %v1310_v42, %v958_v4 }
 0x1ad   :  { %v3566_v55 = vpop.f32.mrf.mxu0  ;;  %v1575_v4 = vmax.f32 %v1511_v57, 0.0  ;;  %v1510_v11 = vadd.f32 %v4328_v49, %v1439_v38 }
 0x1ae   :  { %v1617_v52 = vmax.f32 %v1569_v0, %v1577_v18  ;;  %v1580_v26 = vmax.f32 %v1516_v46, 0.0  ;;  %v1514_v20 = vadd.f32 %v4328_v49, %v1443_v45  ;;  %v1448_v30 = vadd.f32 %v3566_v55, %v979_v62  ;;  %v1018_v46 = vpop.f32.mrf.mxu1 }
 0x1af   :  { %v1323_v44 = vpop.f32.mrf.mxu0  ;;  %v1576_v45 = vmax.f32 %v1512_v43, 0.0  ;;  %v1574_v56 = vmax.f32 %v1510_v11, 0.0  ;;  %v5144_v11 = vld [vmem:[#allocation40_spill] sm:$0xff] }
 0x1b0   :  { %v1620_v24 = vmax.f32 %v1572_v8, %v1580_v26  ;;  %v1578_v25 = vmax.f32 %v1514_v20, 0.0  ;;  %v1519_v34 = vadd.f32 %v4328_v49, %v1448_v30  ;;  %v1446_v41 = vadd.f32 %v1323_v44, %v971_v31 }
 0x1b1   :  { %v3567_v5 = vpop.f32.mrf.mxu0 }
 0x1b2   :  { %v1618_v22 = vmax.f32 %v1570_v51, %v1578_v25  ;;  %v1583_v47 = vmax.f32 %v1519_v34, 0.0  ;;  %v1517_v2 = vadd.f32 %v4328_v49, %v1446_v41  ;;  %v1449_v16 = vadd.f32 %v3567_v5, %v982_v27  ;;  %v5141_v41 = vld [vmem:[#allocation29_spill] sm:$0xff] }
 0x1b3   :  { %v1326_v32 = vpop.f32.mrf.mxu0  ;;  %v1642_v36 = vmax.f32 %v1619_v7, %v1620_v24  ;;  %v995_v1 = vadd.f32 %v4514_v61, %v5141_v41 }
 0x1b4   :  { %v1623_v62 = vmax.f32 %v1575_v4, %v1583_v47  ;;  %v1581_v0 = vmax.f32 %v1517_v2, 0.0  ;;  %v1520_v28 = vadd.f32 %v4328_v49, %v1449_v16  ;;  %v1447_v59 = vadd.f32 %v1326_v32, %v974_v53  ;;  %v5142_v53 = vld [vmem:[#allocation30_spill] sm:$0xff]  ;;  %v5143_v47 = vld [vmem:[#allocation31_spill] sm:$0xff] }
 0x1b5   :  { %v3570_v15 = vpop.f32.mrf.mxu0  ;;  %v4601_v42 = vpack.c.bf16 %v1642_v36, %v1642_v36  ;;  %v1641_v18 = vmax.f32 %v1617_v52, %v1618_v22  ;;  %v3507_v52 = vpop.f32.mrf.mxu1  ;;  %v987_v4 = vadd.f32 %v4521_v23, %v5142_v53  ;;  %v998_v2 = vadd.f32 %v4530_v21, %v5143_v47  ;;  %v5153_v47 = vld [vmem:[#allocation46_spill] sm:$0xff] }
 0x1b6   :  { %v1621_v48 = vmax.f32 %v1573_v12, %v1581_v0  ;;  %v1584_v31 = vmax.f32 %v1520_v28, 0.0  ;;  %v1518_v8 = vadd.f32 %v4328_v49, %v1447_v59  ;;  %v1452_v22 = vadd.f32 %v3570_v15, %v995_v1  ;;  %v5146_v28 = vld [vmem:[#allocation42_spill] sm:$0xff] }
 0x1b7   :  { %1702 = vrot.lane.b32.xlu1 %v4601_v42, %s3711_s1  ;;  %v1339_v57 = vpop.f32.mrf.mxu0  ;;  %v4606_v7 = vpack.c.bf16 %v1641_v18, %v1641_v18  ;;  %v1021_v44 = vpop.f32.mrf.mxu1  ;;  %v1027_v32 = vadd.f32 %v3506_v13, %v5144_v11  ;;  %v1019_v59 = vadd.f32 %v1018_v46, %v5146_v28 }
 0x1b8   :  { %v1624_v55 = vmax.f32 %v1576_v45, %v1584_v31  ;;  %v1582_v26 = vmax.f32 %v1518_v8, 0.0  ;;  %v1450_v16 = vadd.f32 %v1339_v57, %v987_v4  ;;  %v1523_v23 = vadd.f32 %v4328_v49, %v1452_v22  ;;  %v5148_v31 = vld [vmem:[#allocation36_spill] sm:$0xff] }
 0x1b9   :  { %1700 = vrot.lane.b32.xlu0 %v4606_v7, %s3711_s1  ;;  %v3571_v20 = vpop.f32.mrf.mxu0  ;;  %v3510_v5 = vpop.f32.mrf.mxu1  ;;  %v1003_v21 = vadd.f32 %v4560_v35, %v5148_v31 }
 0x1ba   :  { %v1622_v30 = vmax.f32 %v1574_v56, %v1582_v26  ;;  %v1644_v27 = vmax.f32 %v1623_v62, %v1624_v55  ;;  %v1453_v61 = vadd.f32 %v3571_v20, %v998_v2  ;;  %v1521_v8 = vadd.f32 %v4328_v49, %v1450_v16  ;;  %v5149_v56 = vld [vmem:[#allocation37_spill] sm:$0xff]  ;;  %v5150_v55 = vld [vmem:[#allocation43_spill] sm:$0xff] }
 0x1bb   :  { %v1342_v33 = vpop.f32.mrf.mxu0  ;;  %v1034_v18 = vpop.f32.mrf.mxu1  ;;  %v1030_v26 = vadd.f32 %v3507_v52, %v5150_v55  ;;  %v1043_v52 = vadd.f32 %v3510_v5, %v5153_v47 }
 0x1bc   :  { %v1643_v51 = vmax.f32 %v1621_v48, %v1622_v30  ;;  %v4610_v38 = vpack.c.bf16 %v1644_v27, %v1644_v27  ;;  %v5147_v48 = vld [vmem:[#allocation34_spill] sm:$0xff]  ;;  %v5151_v30 = vld [vmem:[#allocation39_spill] sm:$0xff]  ;;  %v1524_v41 = vadd.f32 %v4328_v49, %v1453_v61  ;;  %v1585_v2 = vmax.f32 %v1521_v8, 0.0 }
 0x1bd   :  { %v3574_v3 = vpop.f32.mrf.mxu0  ;;  %v1011_v15 = vadd.f32 %v4550_v37, %v5147_v48  ;;  %v1006_v27 = vadd.f32 %v4588_v10, %v5151_v30  ;;  %v3511_v53 = vpop.f32.mrf.mxu1 }
 0x1be   :  { %v4612_v24 = vpack.c.bf16 %v1643_v51, %v1643_v51  ;;  %1706 = vrot.lane.b32.xlu1 %v4610_v38, %s3711_s1  ;;  %v4616_v34 = vpack.c.bf16 %v1643_v51, %v1642_v36  ;;  %v5145_v36 = vld [vmem:[#allocation33_spill] sm:$0xff] }
 0x1bf   :  { %v1355_v25 = vpop.f32.mrf.mxu0  ;;  %v990_v62 = vadd.f32 %v4534_v58, %v5145_v36  ;;  %v1014_v58 = vadd.f32 %v4578_v14, %v5149_v56  ;;  %v5152_v51 = vld [vmem:[#allocation45_spill] sm:$0xff]  ;;  %v1456_v35 = vadd.f32 %v3574_v3, %v1011_v15  ;;  %v5154_v3 = vld [vmem:[#allocation48_spill] sm:$0xff] }
 0x1c0   :  { %1704 = vrot.lane.b32.xlu0 %v4612_v24, %s3711_s1  ;;  %v1022_v37 = vadd.f32 %v1021_v44, %v5152_v51  ;;  %v1454_v11 = vadd.f32 %v1355_v25, %v1003_v21  ;;  %v1035_v61 = vadd.f32 %v1034_v18, %v5154_v3  ;;  %v5155_v25 = vld [vmem:[#allocation49_spill] sm:$0xff] }
 0x1c1   :  { %v3575_v43 = vpop.f32.mrf.mxu0  ;;  %v1451_v13 = vadd.f32 %v1342_v33, %v990_v62  ;;  %v1587_v33 = vmax.f32 %v1523_v23, 0.0  ;;  %v1527_v28 = vadd.f32 %v4328_v49, %v1456_v35  ;;  %v1046_v21 = vadd.f32 %v3511_v53, %v5155_v25 }
 0x1c3   :  { %v1358_v12 = vpop.f32.mrf.mxu0  ;;  %v1522_v16 = vadd.f32 %v4328_v49, %v1451_v13  ;;  %v1525_v13 = vadd.f32 %v4328_v49, %v1454_v11 }
 0x1c5   :  { %v3578_v0 = vpop.f32.mrf.mxu0  ;;  %v1586_v8 = vmax.f32 %v1522_v16, 0.0  ;;  %v1589_v53 = vmax.f32 %v1525_v13, 0.0 }
 0x1c6   :  { %v1460_v45 = vadd.f32 %v3578_v0, %v1027_v32  ;;  %v1588_v0 = vmax.f32 %v1524_v41, 0.0 }
 0x1c7   :  { %v1371_v57 = vpop.f32.mrf.mxu0 }
 0x1c8   :  { %v1531_v46 = vadd.f32 %v4328_v49, %v1460_v45  ;;  %v1458_v20 = vadd.f32 %v1371_v57, %v1019_v59  ;;  %v1457_v59 = vadd.f32 %v3575_v43, %v1014_v58  ;;  %v1037_v45 = vpop.f32.mrf.mxu1  ;;  %v1455_v57 = vadd.f32 %v1358_v12, %v1006_v27  ;;  %v5156_v43 = vld [vmem:[#allocation51_spill] sm:$0xff] }
 0x1c9   :  { %v3579_v1 = vpop.f32.mrf.mxu0  ;;  %v1038_v58 = vadd.f32 %v1037_v45, %v5156_v43 }
 0x1ca   :  { %v1595_v4 = vmax.f32 %v1531_v46, 0.0  ;;  %v1529_v22 = vadd.f32 %v4328_v49, %v1458_v20  ;;  %v1461_v14 = vadd.f32 %v3579_v1, %v1030_v26  ;;  %v1591_v20 = vmax.f32 %v1527_v28, 0.0 }
 0x1cb   :  { %v1374_v32 = vpop.f32.mrf.mxu0  ;;  %v1528_v30 = vadd.f32 %v4328_v49, %v1457_v59  ;;  %v1526_v12 = vadd.f32 %v4328_v49, %v1455_v57 }
 0x1cc   :  { %v1627_v10 = vmax.f32 %v1587_v33, %v1595_v4  ;;  %v1593_v36 = vmax.f32 %v1529_v22, 0.0  ;;  %v1532_v44 = vadd.f32 %v4328_v49, %v1461_v14  ;;  %v1459_v62 = vadd.f32 %v1374_v32, %v1022_v37 }
 0x1cd   :  { %v3582_v23 = vpop.f32.mrf.mxu0  ;;  %v1592_v16 = vmax.f32 %v1528_v30, 0.0 }
 0x1ce   :  { %v1625_v48 = vmax.f32 %v1585_v2, %v1593_v36  ;;  %v1596_v5 = vmax.f32 %v1532_v44, 0.0  ;;  %v1530_v15 = vadd.f32 %v4328_v49, %v1459_v62  ;;  %v1464_v31 = vadd.f32 %v3582_v23, %v1043_v52 }
 0x1cf   :  { %v1387_v56 = vpop.f32.mrf.mxu0  ;;  %v1590_v62 = vmax.f32 %v1526_v12, 0.0  ;;  %v3672_v12 = vld [vmem:[%s5042_s3 + $0x50] sm:$0xff]  }
 0x1d0   :  { %v1628_v55 = vmax.f32 %v1588_v0, %v1596_v5  ;;  %v1594_v18 = vmax.f32 %v1530_v15, 0.0  ;;  %v1535_v26 = vadd.f32 %v4328_v49, %v1464_v31  ;;  %v1462_v46 = vadd.f32 %v1387_v56, %v1035_v61  ;;  %v3663_v31 = vld [vmem:[%s5042_s3 + $0x38] sm:$0xff]   ;;  %v3665_v56 = vld [vmem:[%s5042_s3 + $0x28] sm:$0xff]  }
 0x1d1   :  { %v3583_v51 = vpop.f32.mrf.mxu0 }
 0x1d2   :  { %v1626_v37 = vmax.f32 %v1586_v8, %v1594_v18  ;;  %v1599_v41 = vmax.f32 %v1535_v26, 0.0  ;;  %v1533_v35 = vadd.f32 %v4328_v49, %v1462_v46  ;;  %v1465_v1 = vadd.f32 %v3583_v51, %v1046_v21  ;;  %v3668_v18 = vld [vmem:[%s5042_s3 + $0x10] sm:$0xff]   ;;  %v3669_v26 = vld [vmem:[%s5042_s3 + $0x8] sm:$0xff]   ;;  %v3670_v51 = vld [vmem:[%s5042_s3] sm:$0xff]  }
 0x1d3   :  { %v1390_v27 = vpop.f32.mrf.mxu0  ;;  %v1646_v33 = vmax.f32 %v1627_v10, %v1628_v55  ;;  %v4690_v21 = vcombine.low %v4458_v39, %v5070_v50 }
 0x1d4   :  { %v1631_v4 = vmax.f32 %v1591_v20, %v1599_v41  ;;  %v1597_v22 = vmax.f32 %v1533_v35, 0.0  ;;  %v1536_v14 = vadd.f32 %v4328_v49, %v1465_v1  ;;  %v1463_v47 = vadd.f32 %v1390_v27, %v1038_v58  ;;  %v3671_v41 = vld [vmem:[%s5042_s3 + $0x58] sm:$0xff]  }
 0x1d5   :  { %v4659_v52 = vpack.c.bf16 %v1646_v33, %v1646_v33  ;;  %v1645_v2 = vmax.f32 %v1625_v48, %v1626_v37  ;;  %v4739_v37 = vcombine.low %v4532_v60, %v5070_v50 }
 0x1d6   :  { %v1629_v11 = vmax.f32 %v1589_v53, %v1597_v22  ;;  %v1600_v32 = vmax.f32 %v1536_v14, 0.0  ;;  %v1534_v36 = vadd.f32 %v4328_v49, %v1463_v47  ;;  %v3085_v47 = vcombine.low %v4610_v38, %v5070_v50 }
 0x1d7   :  { %1710 = vrot.lane.b32.xlu1 %v4659_v52, %s3711_s1  ;;  %v4664_v44 = vpack.c.bf16 %v1645_v2, %v1645_v2 }
 0x1d8   :  { %v1632_v10 = vmax.f32 %v1592_v16, %v1600_v32  ;;  %v1598_v3 = vmax.f32 %v1534_v36, 0.0 }
 0x1d9   :  { %1708 = vrot.lane.b32.xlu0 %v4664_v44, %s3711_s1 }
 0x1da   :  { %v1630_v61 = vmax.f32 %v1590_v62, %v1598_v3  ;;  %v1648_v0 = vmax.f32 %v1631_v4, %v1632_v10 }
 0x1dc   :  { %v4668_v28 = vpack.c.bf16 %v1648_v0, %v1648_v0  ;;  %v1647_v59 = vmax.f32 %v1629_v11, %v1630_v61 }
 0x1de   :  { %1714 = vrot.lane.b32.xlu1 %v4668_v28, %s3711_s1  ;;  %v4672_v49 = vpack.c.bf16 %v1647_v59, %v1647_v59  ;;  %v4674_v23 = vpack.c.bf16 %v1647_v59, %v1646_v33 }
 0x1e0   :  { %1712 = vrot.lane.b32.xlu0 %v4672_v49, %s3711_s1 }
 0x1e4   :  { %1682 = vrot.lane.b32.xlu0 %v5070_v50, %s3711_s1 }
 0x1eb   :  { %v1685_v45 = vpop.permute.xlu0 %1684 }
 0x1ec   :  { %v1721_v5 = vsel %vm1716_vm3, 0, %v1685_v45 }
 0x1ef   :  { %v1687_v48 = vpop.permute.xlu0 %1686 }
 0x1f0   :  { %v1724_v15 = vsel %vm1716_vm3, %v4418_v40, %v1687_v48  ;;  %v3664_v40 = vld [vmem:[%s5042_s3 + $0x30] sm:$0xff]  }
 0x1f1   :  { %v4686_v25 = vcombine.low %v1721_v5, %v1724_v15  ;;  %v3681_v5 = vld [vmem:[%s5044_s5 + $0x60] sm:$0xff]  }
 0x1f2   :  { %v1689_v8 = vpop.permute.xlu1 %1688  ;;  %v3682_v15 = vld [vmem:[%s5044_s5 + $0x20] sm:$0xff]  }
 0x1f3   :  { %2013 = vmatmul.mubr.bf16.vlgmr.msra.gmra.mxu1 %v4686_v25  ;;  %v1727_v57 = vsel %vm1716_vm3, %v4428_v63, %v1689_v8  ;;  %v3666_v63 = vld [vmem:[%s5042_s3 + $0x20] sm:$0xff]  }
 0x1f4   :  { %3103 = vmatprep.mubr.msk.bf16.mxu1 %vm1716_vm3, %v4690_v21  ;;  %2156 = vmatpush1.bf16.msra.mxu1 %v3663_v31  ;;  %v3683_v31 = vld [vmem:[%s5044_s5 + $0x58] sm:$0xff]  }
 0x1f5   :  { %2157 = vmatprep.subr.bf16.mxu1 %v5070_v50 }
 0x1f6   :  { %v1691_v13 = vpop.permute.xlu1 %1690 }
 0x1f7   :  { %v1730_v39 = vsel %vm1716_vm3, %v4440_v6, %v1691_v13  ;;  %v3667_v6 = vld [vmem:[%s5042_s3 + $0x18] sm:$0xff]  }
 0x1f8   :  { %2158 = vmatpush1.bf16.msra.mxu1 %v3664_v40  ;;  %v4706_v55 = vcombine.low %v1727_v57, %v1730_v39 }
 0x1f9   :  { %2159 = vmatprep.subr.bf16.mxu1 %v5070_v50 }
 0x1fb   :  { %2021 = vmatmul.mubr.bf16.gmra.mxu1 %v4706_v55 }
 0x1fc   :  { %3104 = vmatprep.mubr.msk.bf16.mxu1 %vm1716_vm3, %v4536_v9  ;;  %2160 = vmatpush1.bf16.msra.mxu1 %v3665_v56  ;;  %v3685_v56 = vld [vmem:[%s5044_s5 + $0x50] sm:$0xff]  }
 0x1fd   :  { %2161 = vmatprep.subr.bf16.mxu1 %v5070_v50 }
 0x200   :  { %2162 = vmatpush1.bf16.msra.mxu1 %v3666_v63 }
 0x201   :  { %2163 = vmatprep.subr.bf16.mxu1 %v5070_v50 }
 0x204   :  { %2164 = vmatpush1.bf16.msra.mxu1 %v3667_v6 }
 0x205   :  { %2165 = vmatprep.subr.bf16.mxu1 %v5070_v50 }
 0x208   :  { %2166 = vmatpush1.bf16.msra.mxu1 %v3668_v18  ;;  %v3687_v18 = vld [vmem:[%s5044_s5 + $0x48] sm:$0xff]  }
 0x209   :  { %v1695_v46 = vpop.permute.xlu1 %1694  ;;  %2167 = vmatprep.subr.bf16.mxu1 %v5070_v50 }
 0x20a   :  { %v1735_v58 = vsel %vm1716_vm3, %v4526_v29, %v1695_v46  ;;  %v3689_v46 = vld [vmem:[%s5044_s5 + $0x40] sm:$0xff]  }
 0x20b   :  { %v1693_v43 = vpop.permute.xlu0 %1692 }
 0x20c   :  { %v1732_v20 = vsel %vm1716_vm3, 0, %v1693_v43  ;;  %2168 = vmatpush1.bf16.msra.mxu1 %v3669_v26  ;;  %v3688_v26 = vld [vmem:[%s5044_s5 + $0x8] sm:$0xff]   ;;  %v3690_v43 = vld [vmem:[%s5044_s5] sm:$0xff]  }
 0x20d   :  { %v4731_v30 = vcombine.low %v1732_v20, %v1735_v58  ;;  %2169 = vmatprep.subr.bf16.mxu1 %v5070_v50  ;;  %v3691_v58 = vld [vmem:[%s5044_s5 + $0xf8] sm:$0xff]  }
 0x20f   :  { %2029 = vmatmul.mubr.bf16.gmra.mxu1 %v4731_v30  ;;  %2382 = vmatmul.mubr.bf16.vlgmr.msra.gmra.mxu0 %v4731_v30 }
 0x210   :  { %3105 = vmatprep.mubr.msk.bf16.mxu1 %vm1716_vm3, %v4739_v37  ;;  %3169 = vmatprep.mubr.msk.bf16.mxu0 %vm1716_vm3, %v4739_v37  ;;  %v1699_v29 = vpop.permute.xlu1 %1698 }
 0x211   :  { %2170 = vmatpush1.bf16.msra.mxu1 %v3670_v51  ;;  %v1741_v35 = vsel %vm1716_vm3, %v4540_v19, %v1699_v29  ;;  %v3674_v19 = vld [vmem:[%s5042_s3 + $0x40] sm:$0xff]  }
 0x212   :  { %2179 = vmatprep.subr.bf16.mxu1 %v5070_v50  ;;  %v1697_v60 = vpop.permute.xlu0 %1696 }
 0x213   :  { %v1738_v1 = vsel %vm1716_vm3, %v4519_v17, %v1697_v60  ;;  %v3673_v17 = vld [vmem:[%s5042_s3 + $0x48] sm:$0xff]  }
 0x214   :  { %v4755_v53 = vcombine.low %v1738_v1, %v1741_v35 }
 0x215   :  { %2180 = vmatpush2.bf16.msra.mxu1 %v3671_v41 }
 0x216   :  { %2181 = vmatprep.subr.bf16.mxu1 %v5070_v50 }
 0x217   :  { %2037 = vmatmul.mubr.bf16.gmra.mxu1 %v4755_v53  ;;  %2390 = vmatmul.mubr.bf16.gmra.mxu0 %v4755_v53 }
 0x218   :  { %3106 = vmatprep.mubr.msk.bf16.mxu1 %vm1716_vm3, %v4616_v34  ;;  %3170 = vmatprep.mubr.msk.bf16.mxu0 %vm1716_vm3, %v4616_v34 }
 0x219   :  { %2182 = vmatpush2.bf16.msra.mxu1 %v3672_v12 }
 0x21a   :  { %2183 = vmatprep.subr.bf16.mxu1 %v5070_v50 }
 0x21d   :  { %2184 = vmatpush2.bf16.msra.mxu1 %v3673_v17 }
 0x21e   :  { %2185 = vmatprep.subr.bf16.mxu1 %v5070_v50 }
 0x221   :  { %2186 = vmatpush2.bf16.msra.mxu1 %v3674_v19 }
 0x229   :  { %v1703_v27 = vpop.permute.xlu1 %1702 }
 0x22a   :  { %v1746_v4 = vsel %vm1716_vm3, %v4606_v7, %v1703_v27 }
 0x22b   :  { %v1701_v33 = vpop.permute.xlu0 %1700 }
 0x22c   :  { %v1743_v22 = vsel %vm1716_vm3, 0, %v1701_v33 }
 0x22d   :  { %v3082_v14 = vcombine.low %v1743_v22, %v1746_v4 }
 0x22f   :  { %2045 = vmatmul.mubr.bf16.gmra.mxu1 %v3082_v14  ;;  %2398 = vmatmul.mubr.bf16.gmra.mxu0 %v3082_v14 }
 0x230   :  { %3107 = vmatprep.mubr.msk.bf16.mxu1 %vm1716_vm3, %v3085_v47  ;;  %3171 = vmatprep.mubr.msk.bf16.mxu0 %vm1716_vm3, %v3085_v47  ;;  %v1707_v2 = vpop.permute.xlu1 %1706 }
 0x231   :  { %v1752_v11 = vsel %vm1716_vm3, %v4612_v24, %v1707_v2 }
 0x232   :  { %v1705_v16 = vpop.permute.xlu0 %1704 }
 0x233   :  { %v1749_v7 = vsel %vm1716_vm3, %v4601_v42, %v1705_v16  ;;  %v3089_v42 = vcombine.low %v4668_v28, %v5070_v50 }
 0x234   :  { %v3084_v32 = vcombine.low %v1749_v7, %v1752_v11 }
 0x237   :  { %2053 = vmatmul.mubr.bf16.gmra.mxu1 %v3084_v32  ;;  %2406 = vmatmul.mubr.bf16.gmra.mxu0 %v3084_v32 }
 0x238   :  { %3108 = vmatprep.mubr.msk.bf16.mxu1 %vm1716_vm3, %v4674_v23  ;;  %3172 = vmatprep.mubr.msk.bf16.mxu0 %vm1716_vm3, %v4674_v23  ;;  %v3111_v23 = vcombine.low %v5070_v50, %v5070_v50  ;;  %v3675_v50 = vld [vmem:[%s5044_s5 + $0x78] sm:$0xff]  }
 0x239   :  { %3324 = vmatprep.subr.bf16.mxu1 %v3675_v50 }
 0x249   :  { %v1711_v38 = vpop.permute.xlu1 %1710 }
 0x24a   :  { %v1757_v62 = vsel %vm1716_vm3, %v4664_v44, %v1711_v38 }
 0x24b   :  { %v1709_v36 = vpop.permute.xlu0 %1708 }
 0x24c   :  { %v1754_v10 = vsel %vm1716_vm3, 0, %v1709_v36 }
 0x24d   :  { %v3086_v24 = vcombine.low %v1754_v10, %v1757_v62 }
 0x24f   :  { %2061 = vmatmul.mubr.bf16.gmra.mxu1 %v3086_v24  ;;  %2414 = vmatmul.mubr.bf16.gmra.mxu0 %v3086_v24 }
 0x250   :  { %3109 = vmatprep.mubr.msk.bf16.mxu1 %vm1716_vm3, %v3089_v42  ;;  %3173 = vmatprep.mubr.msk.bf16.mxu0 %vm1716_vm3, %v3089_v42  ;;  %v1715_v3 = vpop.permute.xlu1 %1714 }
 0x251   :  { %v1763_v0 = vsel %vm1716_vm3, %v4672_v49, %v1715_v3  ;;  %v3679_v49 = vld [vmem:[%s5044_s5 + $0x68] sm:$0xff]  }
 0x252   :  { %v1713_v61 = vpop.permute.xlu0 %1712 }
 0x253   :  { %v1760_v44 = vsel %vm1716_vm3, %v4659_v52, %v1713_v61  ;;  %v3678_v52 = vld [vmem:[%s5044_s5 + $0x30] sm:$0xff]  }
 0x254   :  { %v3088_v59 = vcombine.low %v1760_v44, %v1763_v0 }
 0x256   :  { %v1683_v45 = vpop.permute.xlu0 %1682 }
 0x257   :  { %2069 = vmatmul.mubr.bf16.gmra.mxu1 %v3088_v59  ;;  %2422 = vmatmul.mubr.bf16.gmra.mxu0 %v3088_v59  ;;  %v1719_v28 = vsel %vm1716_vm3, 0, %v1683_v45 }
 0x258   :  { %3124 = vmatprep.mubr.msk.bf16.mxu1 %vm1716_vm3, %v3111_v23  ;;  %3174 = vmatprep.mubr.msk.bf16.mxu0 %vm1716_vm3, %v3111_v23  ;;  %v3110_v48 = vcombine.low %v1719_v28, %v1719_v28 }
 0x25f   :  { %2188 = vmatmul.mubr.bf16.vlgmr.msra.gmra.mxu1 %v3110_v48  ;;  %2430 = vmatmul.mubr.bf16.gmra.mxu0 %v3110_v48 }
 0x260   :  { %3125 = vmatprep.mubr.msk.bf16.mxu1 %vm1716_vm3, %v3111_v23  ;;  %3175 = vmatprep.mubr.msk.bf16.mxu0 %vm1716_vm3, %v3111_v23 }
 0x267   :  { %2196 = vmatmul.mubr.bf16.gmra.mxu1 %v3110_v48  ;;  %2438 = vmatmul.mubr.bf16.gmra.mxu0 %v3110_v48 }
 0x268   :  { %3126 = vmatprep.mubr.msk.bf16.mxu1 %vm1716_vm3, %v4438_v54  ;;  %v3676_v54 = vld [vmem:[%s5044_s5 + $0x38] sm:$0xff]  }
 0x269   :  { %3325 = vmatpush3.bf16.msra.mxu1 %v3676_v54 }
 0x26f   :  { %2204 = vmatmul.mubr.bf16.gmra.mxu1 %v4686_v25  ;;  %v3684_v25 = vld [vmem:[%s5044_s5 + $0x18] sm:$0xff]  }
 0x270   :  { %3127 = vmatprep.mubr.msk.bf16.mxu1 %vm1716_vm3, %v4690_v21 }
 0x277   :  { %2212 = vmatmul.mubr.bf16.gmra.mxu1 %v4706_v55  ;;  %v3686_v55 = vld [vmem:[%s5044_s5 + $0x10] sm:$0xff]  }
 0x278   :  { %3128 = vmatprep.mubr.msk.bf16.mxu1 %vm1716_vm3, %v4536_v9  ;;  %v3677_v9 = vld [vmem:[%s5044_s5 + $0x70] sm:$0xff]  }
 0x279   :  { %3326 = vmatprep.subr.bf16.mxu1 %v3677_v9 }
 0x27a   :  { %3327 = vmatpush3.bf16.msra.mxu1 %v3678_v52 }
 0x27b   :  { %3328 = vmatprep.subr.bf16.mxu1 %v3679_v49 }
 0x27f   :  { %2220 = vmatmul.mubr.bf16.gmra.mxu1 %v4731_v30 }
 0x280   :  { %3129 = vmatprep.mubr.msk.bf16.mxu1 %vm1716_vm3, %v4739_v37 }
 0x287   :  { %2228 = vmatmul.mubr.bf16.gmra.mxu1 %v4755_v53 }
 0x288   :  { %3130 = vmatprep.mubr.msk.bf16.mxu1 %vm1716_vm3, %v4616_v34  ;;  %v3680_v34 = vld [vmem:[%s5044_s5 + $0x28] sm:$0xff]  }
 0x289   :  { %3329 = vmatpush3.bf16.msra.mxu1 %v3680_v34 }
 0x28a   :  { %3330 = vmatprep.subr.bf16.mxu1 %v3681_v5 }
 0x28d   :  { %3331 = vmatpush3.bf16.msra.mxu1 %v3682_v15 }
 0x28e   :  { %3332 = vmatprep.subr.bf16.mxu1 %v3683_v31 }
 0x28f   :  { %2236 = vmatmul.mubr.bf16.gmra.mxu1 %v3082_v14 }
 0x290   :  { %3131 = vmatprep.mubr.msk.bf16.mxu1 %vm1716_vm3, %v3085_v47 }
 0x291   :  { %3333 = vmatpush3.bf16.msra.mxu1 %v3684_v25 }
 0x292   :  { %3334 = vmatprep.subr.bf16.mxu1 %v3685_v56 }
 0x295   :  { %3335 = vmatpush3.bf16.msra.mxu1 %v3686_v55 }
 0x296   :  { %3336 = vmatprep.subr.bf16.mxu1 %v3687_v18 }
 0x297   :  { %2244 = vmatmul.mubr.bf16.gmra.mxu1 %v3084_v32 }
 0x299   :  { %3337 = vmatpush3.bf16.msra.mxu1 %v3688_v26 }
 0x29a   :  { %3338 = vmatprep.subr.bf16.mxu1 %v3689_v46 }
 0x29d   :  { %3339 = vmatpush3.bf16.msra.mxu1 %v3690_v43 }
 0x29e   :  { %3346 = vmatprep.subr.bf16.mxu1 %v3691_v58 }
 0x2b3   :  { %v4853_v21 = vpop.f32.mrf.mxu1 }
 0x2b5   :  { %v2016_v8 = vpop.f32.mrf.mxu1 }
 0x2b7   :  { %v4855_v40 = vpop.f32.mrf.mxu1 }
 0x2b9   :  { %v2019_v13 = vpop.f32.mrf.mxu1 }
 0x2bb   :  { %v4857_v57 = vpop.f32.mrf.mxu1 }
 0x2bd   :  { %v2024_v39 = vpop.f32.mrf.mxu1 }
 0x2bf   :  { %v4865_v63 = vpop.f32.mrf.mxu1 }
 0x2c1   :  { %v2027_v6 = vpop.f32.mrf.mxu1 }
 0x2cf   :  { %v4882_v20 = vpop.f32.mrf.mxu1  ;;  %v4884_v30 = vpop.f32.mrf.mxu0 }
 0x2d1   :  { %v2032_v51 = vpop.f32.mrf.mxu1  ;;  %v2385_v37 = vpop.f32.mrf.mxu0 }
 0x2d3   :  { %v4886_v29 = vpop.f32.mrf.mxu1  ;;  %v4888_v41 = vpop.f32.mrf.mxu0 }
 0x2d5   :  { %v2035_v60 = vpop.f32.mrf.mxu1  ;;  %v2388_v35 = vpop.f32.mrf.mxu0 }
 0x2d7   :  { %v4890_v1 = vpop.f32.mrf.mxu1  ;;  %v4892_v53 = vpop.f32.mrf.mxu0 }
 0x2d9   :  { %v2040_v12 = vpop.f32.mrf.mxu1  ;;  %v2393_v17 = vpop.f32.mrf.mxu0 }
 0x2db   :  { %v4894_v19 = vpop.f32.mrf.mxu1  ;;  %v4896_v27 = vpop.f32.mrf.mxu0 }
 0x2dd   :  { %v2043_v33 = vpop.f32.mrf.mxu1  ;;  %v2396_v4 = vpop.f32.mrf.mxu0 }
 0x2ef   :  { %v4898_v22 = vpop.f32.mrf.mxu1  ;;  %v2399_v14 = vpop.f32.mrf.mxu0 }
 0x2f1   :  { %v2048_v47 = vpop.f32.mrf.mxu1  ;;  %v2401_v2 = vpop.f32.mrf.mxu0 }
 0x2f3   :  { %v4900_v16 = vpop.f32.mrf.mxu1  ;;  %v2402_v11 = vpop.f32.mrf.mxu0 }
 0x2f5   :  { %v2051_v7 = vpop.f32.mrf.mxu1  ;;  %v2404_v32 = vpop.f32.mrf.mxu0 }
 0x2f7   :  { %v4902_v38 = vpop.f32.mrf.mxu1  ;;  %v2407_v36 = vpop.f32.mrf.mxu0 }
 0x2f9   :  { %v2056_v62 = vpop.f32.mrf.mxu1  ;;  %v2409_v10 = vpop.f32.mrf.mxu0 }
 0x2fb   :  { %v4904_v24 = vpop.f32.mrf.mxu1  ;;  %v4906_v42 = vpop.f32.mrf.mxu0 }
 0x2fd   :  { %v2059_v3 = vpop.f32.mrf.mxu1  ;;  %v2412_v61 = vpop.f32.mrf.mxu0 }
 0x30f   :  { %v4908_v0 = vpop.f32.mrf.mxu1  ;;  %v4910_v44 = vpop.f32.mrf.mxu0 }
 0x311   :  { %v2064_v59 = vpop.f32.mrf.mxu1  ;;  %v2417_v23 = vpop.f32.mrf.mxu0 }
 0x313   :  { %v4912_v45 = vpop.f32.mrf.mxu1  ;;  %v4914_v28 = vpop.f32.mrf.mxu0 }
 0x315   :  { %v2067_v48 = vpop.f32.mrf.mxu1  ;;  %v2420_v50 = vpop.f32.mrf.mxu0 }
 0x317   :  { %v4916_v54 = vpop.f32.mrf.mxu1  ;;  %v4918_v9 = vpop.f32.mrf.mxu0 }
 0x319   :  { %v2072_v52 = vpop.f32.mrf.mxu1  ;;  %v2425_v49 = vpop.f32.mrf.mxu0 }
 0x31b   :  { %v4920_v34 = vpop.f32.mrf.mxu1  ;;  %v4922_v5 = vpop.f32.mrf.mxu0 }
 0x31d   :  { %v2075_v15 = vpop.f32.mrf.mxu1  ;;  %v2428_v31 = vpop.f32.mrf.mxu0 }
 0x31f   :  { %v2189_v25 = vpop.f32.mrf.mxu1  ;;  %v4924_v8 = vpop.f32.mrf.mxu0 }
 0x320   :  { %v2190_v7 = vadd.f32 %v2189_v25, %v4853_v21 }
 0x321   :  { %v2191_v13 = vpop.f32.mrf.mxu1  ;;  %v2433_v39 = vpop.f32.mrf.mxu0 }
 0x323   :  { %v2192_v56 = vpop.f32.mrf.mxu1  ;;  %v4926_v55 = vpop.f32.mrf.mxu0 }
 0x324   :  { %v2193_v33 = vadd.f32 %v2192_v56, %v4855_v40  ;;  %v4942_v40 = vld [vmem:[%s5045_s4] ss:$0 sm:$0xff] }
 0x325   :  { %v2194_v6 = vpop.f32.mrf.mxu1  ;;  %v2436_v18 = vpop.f32.mrf.mxu0 }
 0x326   :  { %v2447_v61 = vadd.f32 %v4888_v41, %v2193_v33 }
 0x327   :  { %v2197_v26 = vpop.f32.mrf.mxu1  ;;  %v4928_v46 = vpop.f32.mrf.mxu0 }
 0x328   :  { %v2198_v62 = vadd.f32 %v2197_v26, %v4857_v57  ;;  %v2470_v41 = vadd.f32 %v4942_v40, %v2447_v61  ;;  %v3694_v61 = vld [vmem:[%s5044_s5 + $0xb0] sm:$0xff]  }
 0x329   :  { %v2199_v43 = vpop.f32.mrf.mxu1  ;;  %v2441_v58 = vpop.f32.mrf.mxu0 }
 0x32a   :  { %v2448_v57 = vadd.f32 %v4892_v53, %v2198_v62 }
 0x32b   :  { %v2200_v51 = vpop.f32.mrf.mxu1  ;;  %v4930_v37 = vpop.f32.mrf.mxu0 }
 0x32c   :  { %v2201_v10 = vadd.f32 %v2200_v51, %v4865_v63  ;;  %v2471_v31 = vadd.f32 %v4942_v40, %v2448_v57 }
 0x32d   :  { %v2202_v60 = vpop.f32.mrf.mxu1  ;;  %v2444_v35 = vpop.f32.mrf.mxu0 }
 0x32e   :  { %v2449_v63 = vadd.f32 %v4896_v27, %v2201_v10  ;;  %v3693_v10 = vld [vmem:[%s5044_s5 + $0xf0] sm:$0xff]  }
 0x32f   :  { %v2205_v12 = vpop.f32.mrf.mxu1 }
 0x330   :  { %v2206_v4 = vadd.f32 %v2205_v12, %v4882_v20  ;;  %v2472_v53 = vadd.f32 %v4942_v40, %v2449_v63 }
 0x331   :  { %v2207_v17 = vpop.f32.mrf.mxu1 }
 0x332   :  { %v2450_v59 = vadd.f32 %v2399_v14, %v2206_v4  ;;  %v2488_v43 = vmax.f32 %v2472_v53, 0.0 }
 0x333   :  { %v2208_v47 = vpop.f32.mrf.mxu1 }
 0x334   :  { %v2209_v2 = vadd.f32 %v2208_v47, %v4886_v29  ;;  %v2446_v29 = vadd.f32 %v4884_v30, %v2190_v7  ;;  %v2473_v14 = vadd.f32 %v4942_v40, %v2450_v59 }
 0x335   :  { %v2210_v32 = vpop.f32.mrf.mxu1 }
 0x336   :  { %v2451_v3 = vadd.f32 %v2402_v11, %v2209_v2  ;;  %v2489_v25 = vmax.f32 %v2473_v14, 0.0  ;;  %v3692_v2 = vld [vmem:[%s5044_s5 + $0xb8] sm:$0xff]  }
 0x337   :  { %v2213_v23 = vpop.f32.mrf.mxu1 }
 0x338   :  { %v2214_v20 = vadd.f32 %v2213_v23, %v4890_v1  ;;  %v2474_v21 = vadd.f32 %v4942_v40, %v2451_v3  ;;  %v2469_v1 = vadd.f32 %v4942_v40, %v2446_v29 }
 0x339   :  { %v2215_v48 = vpop.f32.mrf.mxu1 }
 0x33a   :  { %v2452_v11 = vadd.f32 %v2407_v36, %v2214_v20  ;;  %v2490_v30 = vmax.f32 %v2474_v21, 0.0  ;;  %v2486_v36 = vmax.f32 %v2470_v41, 0.0  ;;  %v2485_v6 = vmax.f32 %v2469_v1, 0.0  ;;  %v3696_v48 = vld [vmem:[%s5044_s5 + $0xa8] sm:$0xff]  }
 0x33b   :  { %v2216_v50 = vpop.f32.mrf.mxu1 }
 0x33c   :  { %v2475_v52 = vadd.f32 %v4942_v40, %v2452_v11  ;;  %v2217_v49 = vadd.f32 %v2216_v50, %v4894_v19  ;;  %v2502_v18 = vmax.f32 %v2486_v36, %v2490_v30  ;;  %v2487_v19 = vmax.f32 %v2471_v31, 0.0  ;;  %v3697_v11 = vld [vmem:[%s5044_s5 + $0xe0] sm:$0xff]  }
 0x33d   :  { %v2218_v15 = vpop.f32.mrf.mxu1  ;;  %v2501_v51 = vmax.f32 %v2485_v6, %v2489_v25 }
 0x33e   :  { %v2453_v27 = vadd.f32 %v4906_v42, %v2217_v49  ;;  %v2491_v39 = vmax.f32 %v2475_v52, 0.0 }
 0x33f   :  { %v2221_v13 = vpop.f32.mrf.mxu1  ;;  %v2509_v17 = vmax.f32 %v2501_v51, %v2502_v18 }
 0x340   :  { %v2476_v56 = vadd.f32 %v4942_v40, %v2453_v27  ;;  %v2503_v35 = vmax.f32 %v2487_v19, %v2491_v39  ;;  %v2222_v32 = vadd.f32 %v2221_v13, %v4898_v22  ;;  %v3695_v22 = vld [vmem:[%s5044_s5 + $0xe8] sm:$0xff]  }
 0x341   :  { %v2223_v26 = vpop.f32.mrf.mxu1  ;;  %v2513_v7 = vpack.c.bf16 %v2509_v17, %v2509_v17  ;;  %v3704_v17 = vld [vmem:[%s5044_s5 + $0x88] sm:$0xff]  }
 0x342   :  { %v2492_v58 = vmax.f32 %v2476_v56, 0.0  ;;  %v2454_v59 = vadd.f32 %v4910_v44, %v2222_v32 }
 0x343   :  { %v2224_v60 = vpop.f32.mrf.mxu1 }
 0x344   :  { %v2504_v12 = vmax.f32 %v2488_v43, %v2492_v58  ;;  %v2225_v20 = vadd.f32 %v2224_v60, %v4900_v16  ;;  %v2477_v57 = vadd.f32 %v4942_v40, %v2454_v59  ;;  %v3702_v43 = vld [vmem:[%s5044_s5 + $0x90] sm:$0xff]  }
 0x345   :  { %v2226_v33 = vpop.f32.mrf.mxu1 }
 0x346   :  { %v2510_v4 = vmax.f32 %v2503_v35, %v2504_v12  ;;  %v2455_v16 = vadd.f32 %v4914_v28, %v2225_v20  ;;  %v2493_v52 = vmax.f32 %v2477_v57, 0.0  ;;  %v3699_v28 = vld [vmem:[%s5044_s5 + $0xd8] sm:$0xff]  }
 0x347   :  { %v2229_v42 = vpop.f32.mrf.mxu1 }
 0x348   :  { %v2514_v47 = vpack.c.bf16 %v2510_v4, %v2510_v4  ;;  %v2230_v44 = vadd.f32 %v2229_v42, %v4902_v38  ;;  %v3698_v38 = vld [vmem:[%s5044_s5 + $0xa0] sm:$0xff]  }
 0x349   :  { %v2231_v62 = vpop.f32.mrf.mxu1  ;;  %v3705_v4 = vld [vmem:[%s5044_s5 + $0xc0] sm:$0xff]  }
 0x34a   :  { %2812 = vmatprep.mubr.bf16.mxu1 %v2514_v47  ;;  %v2456_v49 = vadd.f32 %v4918_v9, %v2230_v44  ;;  %v3700_v9 = vld [vmem:[%s5044_s5 + $0x98] sm:$0xff]   ;;  %v14_v62 = vstv %s5046_s8 }
 0x34b   :  { %v2232_v3 = vpop.f32.mrf.mxu1  ;;  %2813 = vmatmul.mubr.bf16.vlgmr.msra.gmra.mxu1 %v2513_v7  ;;  %15 = vst [vmem:[#allocation2] sm:$0x1] %v14_v62 }
 0x34c   :  { %3347 = vmatpush3.bf16.msra.mxu1 %v3692_v2  ;;  %v2233_v30 = vadd.f32 %v2232_v3, %v4904_v24  ;;  %v2479_v25 = vadd.f32 %v4942_v40, %v2456_v49  ;;  %v3701_v24 = vld [vmem:[%s5044_s5 + $0xd0] sm:$0xff]  }
 0x34d   :  { %v2234_v23 = vpop.f32.mrf.mxu1  ;;  %3348 = vmatprep.subr.bf16.mxu1 %v3693_v10 }
 0x34e   :  { %v2457_v39 = vadd.f32 %v4922_v5, %v2233_v30  ;;  %v2495_v58 = vmax.f32 %v2479_v25, 0.0  ;;  %v3703_v5 = vld [vmem:[%s5044_s5 + $0xc8] sm:$0xff]  }
 0x34f   :  { %v2237_v29 = vpop.f32.mrf.mxu1 }
 0x350   :  { %v2238_v21 = vadd.f32 %v2237_v29, %v4908_v0  ;;  %3349 = vmatpush3.bf16.msra.mxu1 %v3694_v61 }
 0x351   :  { %v2239_v63 = vpop.f32.mrf.mxu1  ;;  %3350 = vmatprep.subr.bf16.mxu1 %v3695_v22  ;;  %v3177_v22 = vld [vmem:[%s5047_s6] ss:$0 sm:$0xff] }
 0x352   :  { %v2458_v41 = vadd.f32 %v4924_v8, %v2238_v21  ;;  %v2478_v8 = vadd.f32 %v4942_v40, %v2455_v16 }
 0x353   :  { %v2240_v0 = vpop.f32.mrf.mxu1 }
 0x354   :  { %v2481_v14 = vadd.f32 %v4942_v40, %v2458_v41  ;;  %v2241_v50 = vadd.f32 %v2240_v0, %v4912_v45  ;;  %3351 = vmatpush3.bf16.msra.mxu1 %v3696_v48 }
 0x355   :  { %v2242_v1 = vpop.f32.mrf.mxu1  ;;  %3352 = vmatprep.subr.bf16.mxu1 %v3697_v11  ;;  %v3210_v11 = vld [vmem:[%s5048_s7] ss:$0 sm:$0xff] }
 0x356   :  { %v2497_v15 = vmax.f32 %v2481_v14, 0.0  ;;  %v2459_v45 = vadd.f32 %v4926_v55, %v2241_v50  ;;  %v2494_v55 = vmax.f32 %v2478_v8, 0.0  ;;  %v3211_v14 = vld [vmem:[#allocation2] ss:$0 sm:$0xff] }
 0x357   :  { %v2245_v31 = vpop.f32.mrf.mxu1 }
 0x358   :  { %v2505_v53 = vmax.f32 %v2493_v52, %v2497_v15  ;;  %v2482_v27 = vadd.f32 %v4942_v40, %v2459_v45  ;;  %v2246_v36 = vadd.f32 %v2245_v31, %v4916_v54  ;;  %3353 = vmatpush3.bf16.msra.mxu1 %v3698_v38 }
 0x359   :  { %v2247_v13 = vpop.f32.mrf.mxu1  ;;  %3354 = vmatprep.subr.bf16.mxu1 %v3699_v28 }
 0x35a   :  { %v2498_v56 = vmax.f32 %v2482_v27, 0.0  ;;  %v2460_v6 = vadd.f32 %v4928_v46, %v2246_v36  ;;  %v2480_v46 = vadd.f32 %v4942_v40, %v2457_v39 }
 0x35b   :  { %v2248_v54 = vpop.f32.mrf.mxu1 }
 0x35c   :  { %v2506_v18 = vmax.f32 %v2494_v55, %v2498_v56  ;;  %v2483_v26 = vadd.f32 %v4942_v40, %v2460_v6  ;;  %v2249_v19 = vadd.f32 %v2248_v54, %v4920_v34  ;;  %3355 = vmatpush3.bf16.msra.mxu1 %v3700_v9  ;;  %v2496_v42 = vmax.f32 %v2480_v46, 0.0 }
 0x35d   :  { %v2250_v51 = vpop.f32.mrf.mxu1  ;;  %3356 = vmatprep.subr.bf16.mxu1 %v3701_v24 }
 0x35e   :  { %v2511_v60 = vmax.f32 %v2505_v53, %v2506_v18  ;;  %v2499_v35 = vmax.f32 %v2483_v26, 0.0  ;;  %v2461_v12 = vadd.f32 %v4930_v37, %v2249_v19  ;;  %v3706_v37 = vld [vmem:[%s5044_s5 + $0x80] sm:$0xff]  }
 0x360   :  { %v2484_v34 = vadd.f32 %v4942_v40, %v2461_v12  ;;  %3357 = vmatpush3.bf16.msra.mxu1 %v3702_v43  ;;  %v2507_v33 = vmax.f32 %v2495_v58, %v2499_v35  ;;  %v2515_v32 = vpack.c.bf16 %v2511_v60, %v2511_v60 }
 0x361   :  { %3358 = vmatprep.subr.bf16.mxu1 %v3703_v5 }
 0x362   :  { %v2500_v47 = vmax.f32 %v2484_v34, 0.0 }
 0x364   :  { %3359 = vmatpush3.bf16.msra.mxu1 %v3704_v17  ;;  %v2508_v2 = vmax.f32 %v2496_v42, %v2500_v47 }
 0x365   :  { %3360 = vmatprep.subr.bf16.mxu1 %v3705_v4 }
 0x366   :  { %v2512_v40 = vmax.f32 %v2507_v33, %v2508_v2 }
 0x368   :  { %3361 = vmatpush3.bf16.msra.mxu1 %v3706_v37  ;;  %v2516_v7 = vpack.c.bf16 %v2512_v40, %v2512_v40 }
 0x36a   :  { %2852 = vmatprep.mubr.bf16.mxu1 %v2516_v7 }
 0x36b   :  { %2853 = vmatmul.mubr.bf16.vlgmr.msra.gmra.mxu1 %v2515_v32 }
 0x40b   :  { %v3340_v10 = vpop.f32.mrf.mxu1 }
 0x40d   :  { %v3341_v3 = vpop.f32.mrf.mxu1 }
 0x40e   :  { %v3342_v23 = vadd.f32 %v3341_v3, %v3340_v10 }
 0x40f   :  { %v3343_v61 = vpop.f32.mrf.mxu1 }
 0x410   :  { %v2815_v21 = vadd.f32 %v3342_v23, %v3177_v22 }
 0x411   :  { %v3344_v59 = vpop.f32.mrf.mxu1 }
 0x42b   :  { %v3362_v20 = vpop.f32.mrf.mxu1 }
 0x42d   :  { %v3363_v29 = vpop.f32.mrf.mxu1 }
 0x42e   :  { %v3364_v48 = vadd.f32 %v3363_v29, %v3362_v20 }
 0x42f   :  { %v3365_v57 = vpop.f32.mrf.mxu1 }
 0x430   :  { %v2855_v44 = vadd.f32 %v3364_v48, %v2815_v21 }
 0x431   :  { %v3366_v63 = vpop.f32.mrf.mxu1 }
 0x432   :  { %v2860_v16 = vmax.f32 %v2855_v44, 0.0 }
 0x434   :  { %v2868_v41 = vmul.f32 %v3210_v11, %v2860_v16 }
 0x436   :  { %v2869_v0 = vsel %vm1716_vm3, %v2868_v41, 0.0 }
 0x437   :  { %2870 = vadd.xlane.f32.xlu1 %v2869_v0 }
 0x4c0   :  { %v2871_v50 = vpop.xlane.xlu1 %2870 }
 0x4c1   :  { %v2879_v38 = vadd.f32 %v3211_v14, %v2871_v50 }
 0x4c3   :  { %3707 = vtanh.f32 %v2879_v38 }
 0x4d0   :  { %v3708_v52 = vpop.eup %3707 }
 0x4d1   :  { %2882 = vst.msk [vmem:[%s5049_s9] sm:$0xff] %vm2881_vm4, %v3708_v52 }

</bundles_post_ra>
